<compile_context>
chip_gen: v5e
topology: v5e:2x2
jax: 0.10.0
libtpu: 0.0.40
codegen_flags: <defaults>
</compile_context>

<pallas_src>
import math

import jax
import jax.numpy as jnp
import numpy as np
from jax.experimental import pallas as pl
from jax.experimental.pallas import tpu as pltpu

# Model hyper-parameters (small, consistent with the module's __init__).
D = 32          # size
H = 4           # num_heads
HD = D // H     # head size
FF = 64         # ff_size
EPS = 1e-6
NEG_INF = -1e30  # stands in for float('-inf') of masked_fill


# ---------------------------------------------------------------------------
# In-kernel helpers.
# ---------------------------------------------------------------------------
def _layer_norm_rows(x, gamma, beta):
    # BertLayerNorm: mean/var over last dim, eps inside sqrt. x: (M, D).
    u = jnp.mean(x, axis=-1, keepdims=True)
    s = jnp.mean((x - u) ** 2, axis=-1, keepdims=True)
    return gamma * ((x - u) * jax.lax.rsqrt(s + EPS)) + beta


def _attention_heads(q3, k3, v3, bias):
    """Multi-head attention for a block of batch elements.

    q3: (Bb, Tq, D); k3/v3: (Bb, Tk, D); bias additive, broadcastable to
    (Bb, Tq, Tk) with 0.0 = attend, -1e30 = masked.  Returns (Bb*Tq, D).
    Per head we do ONE batched (over Bb) score matmul and ONE batched context
    matmul (single batch-dim dot_general, the TPU-supported form).
    """
    Bb, Tq, _ = q3.shape
    ctx_heads = []
    for h in range(H):                       # static unroll, H == 4
        sl = slice(h * HD, (h + 1) * HD)
        s = jnp.einsum('bqd,bkd->bqk', q3[:, :, sl], k3[:, :, sl],
                       preferred_element_type=jnp.float32)
        s = s + bias                                           # additive mask
        s = s - jnp.max(s, axis=-1, keepdims=True)
        p = jnp.exp(s)
        denom = jnp.sum(p, axis=-1, keepdims=True)
        p = p * pl.reciprocal(denom, approx=True)              # EUP, not VPU
        ctx_heads.append(jnp.einsum('bqk,bkd->bqd', p, v3[:, :, sl],
                                    preferred_element_type=jnp.float32))
    ctx = jnp.concatenate(ctx_heads, axis=-1)                  # (Bb, Tq, D)
    return ctx.reshape(Bb * Tq, D)


# ---------------------------------------------------------------------------
# Pallas kernel: one grid step = one block of B_blk batch elements.
# ---------------------------------------------------------------------------
def decoder_layer_kernel(
    x_ref, mem_ref, trg_mask_ref, src_mask_ref,
    ln_g_ref, ln_b_ref,                    # (3, D): [x_ln, dec_ln, ff_ln]
    a1_kvq_w_ref, a1_kvq_b_ref,            # self-attn fused [Wk|Wv|Wq]
    a1_o_w_ref, a1_o_b_ref,                # self-attn output proj
    a2_kv_w_ref, a2_kv_b_ref,              # cross-attn fused [Wk|Wv]
    a2_q_w_ref, a2_q_b_ref,                # cross-attn Q proj
    a2_o_w_ref, a2_o_b_ref,                # cross-attn output proj
    ff_w1_ref, ff_b1_ref, ff_w2_ref, ff_b2_ref,
    o_ref,
):
    Bb, T, Dm = x_ref.shape
    S = mem_ref.shape[1]
    M = Bb * T
    inv_sqrt_hd = 1.0 / math.sqrt(HD)

    ln_g = ln_g_ref[...]
    ln_b = ln_b_ref[...]

    # Additive attention biases, computed once per step (shared by all heads).
    trg_bias = jnp.where(trg_mask_ref[...] > 0, 0.0, NEG_INF)   # (Bb, T, T)
    src_bias = jnp.where(src_mask_ref[...] > 0, 0.0, NEG_INF)   # (Bb, 1, S)

    # Fold batch into the matmul M dimension.
    x = x_ref[...].reshape(M, Dm)

    # ---- 1) self-attention block -----------------------------------------
    x_norm = _layer_norm_rows(x, ln_g[0], ln_b[0])
    kvq = jnp.dot(x_norm, a1_kvq_w_ref[...],
                  preferred_element_type=jnp.float32) + a1_kvq_b_ref[...]
    k1 = kvq[:, 0:Dm].reshape(Bb, T, Dm)
    v1 = kvq[:, Dm:2 * Dm].reshape(Bb, T, Dm)
    q1 = (kvq[:, 2 * Dm:3 * Dm] * inv_sqrt_hd).reshape(Bb, T, Dm)
    ctx1 = _attention_heads(q1, k1, v1, trg_bias)               # (M, D)
    h1 = (jnp.dot(ctx1, a1_o_w_ref[...], preferred_element_type=jnp.float32)
          + a1_o_b_ref[...]) + x                                # dropout = id

    # ---- 2) cross-attention block ------------------------------------------
    h1_norm = _layer_norm_rows(h1, ln_g[1], ln_b[1])
    mem = mem_ref[...].reshape(Bb * S, Dm)
    kv = jnp.dot(mem, a2_kv_w_ref[...],
                 preferred_element_type=jnp.float32) + a2_kv_b_ref[...]
    k2 = kv[:, 0:Dm].reshape(Bb, S, Dm)
    v2 = kv[:, Dm:2 * Dm].reshape(Bb, S, Dm)
    q2 = ((jnp.dot(h1_norm, a2_q_w_ref[...],
                   preferred_element_type=jnp.float32) + a2_q_b_ref[...])
          * inv_sqrt_hd).reshape(Bb, T, Dm)
    ctx2 = _attention_heads(q2, k2, v2, src_bias)               # (M, D)
    h2 = (jnp.dot(ctx2, a2_o_w_ref[...], preferred_element_type=jnp.float32)
          + a2_o_b_ref[...]) + h1                               # dropout = id

    # ---- 3) position-wise feed-forward (pre-LN + residual) -----------------
    ff_in = _layer_norm_rows(h2, ln_g[2], ln_b[2])
    ff = jnp.maximum(
        jnp.dot(ff_in, ff_w1_ref[...], preferred_element_type=jnp.float32)
        + ff_b1_ref[...], 0.0)
    ff = jnp.dot(ff, ff_w2_ref[...],
                 preferred_element_type=jnp.float32) + ff_b2_ref[...]
    out = ff + h2

    o_ref[...] = out.reshape(Bb, T, Dm).astype(o_ref.dtype)


# ---------------------------------------------------------------------------
# Wrapper: weight packing, batch blocking, pallas_call.
# ---------------------------------------------------------------------------
def transformer_decoder_layer(x, memory, src_mask, trg_mask, params, b_blk=None):
    B, T, Dm = x.shape
    S = memory.shape[1]
    assert Dm == D

    (ln_g, ln_b, a1_w, a1_b, a2_w, a2_b, ff_w1, ff_b1, ff_w2, ff_b2) = params

    # Fuse QKV weights so each attention does one wide projection matmul.
    a1_kvq_w = jnp.concatenate([a1_w[0], a1_w[1], a1_w[2]], axis=1)   # (D, 3D)
    a1_kvq_b = jnp.concatenate([a1_b[0], a1_b[1], a1_b[2]]).reshape(1, 3 * Dm)
    a1_o_w, a1_o_b = a1_w[3], a1_b[3].reshape(1, Dm)
    a2_kv_w = jnp.concatenate([a2_w[0], a2_w[1]], axis=1)             # (D, 2D)
    a2_kv_b = jnp.concatenate([a2_b[0], a2_b[1]]).reshape(1, 2 * Dm)
    a2_q_w, a2_q_b = a2_w[2], a2_b[2].reshape(1, Dm)
    a2_o_w, a2_o_b = a2_w[3], a2_b[3].reshape(1, Dm)

    # Fold many batch elements into each grid step: aim for >=128 rows/step so
    # the MXU sees >=128-row matmuls and the ~0.35us/step overhead amortizes.
    # For larger B the cdiv below yields >=2 "parallel" steps (v7x megacore).
    if b_blk is None:
        b_blk = max(1, min(B, max(1, 128 // max(T, 1))))
    n_blk = pl.cdiv(B, b_blk)
    B_pad = n_blk * b_blk
    if B_pad != B:
        pad = B_pad - B
        x = jnp.pad(x, ((0, pad), (0, 0), (0, 0)))
        memory = jnp.pad(memory, ((0, pad), (0, 0), (0, 0)))
        trg_mask = jnp.pad(trg_mask, ((0, pad), (0, 0), (0, 0)),
                           constant_values=1.0)
        src_mask = jnp.pad(src_mask, ((0, pad), (0, 0), (0, 0)),
                           constant_values=1.0)

    in_specs = [
        pl.BlockSpec((b_blk, T, Dm), lambda i: (i, 0, 0)),    # x
        pl.BlockSpec((b_blk, S, Dm), lambda i: (i, 0, 0)),    # memory
        pl.BlockSpec((b_blk, T, T), lambda i: (i, 0, 0)),     # trg_mask
        pl.BlockSpec((b_blk, 1, S), lambda i: (i, 0, 0)),     # src_mask
        pl.BlockSpec((3, Dm), lambda i: (0, 0)),              # ln gamma
        pl.BlockSpec((3, Dm), lambda i: (0, 0)),              # ln beta
        pl.BlockSpec((Dm, 3 * Dm), lambda i: (0, 0)),         # self KVQ W
        pl.BlockSpec((1, 3 * Dm), lambda i: (0, 0)),          # self KVQ b
        pl.BlockSpec((Dm, Dm), lambda i: (0, 0)),             # self out W
        pl.BlockSpec((1, Dm), lambda i: (0, 0)),              # self out b
        pl.BlockSpec((Dm, 2 * Dm), lambda i: (0, 0)),         # cross KV W
        pl.BlockSpec((1, 2 * Dm), lambda i: (0, 0)),          # cross KV b
        pl.BlockSpec((Dm, Dm), lambda i: (0, 0)),             # cross Q W
        pl.BlockSpec((1, Dm), lambda i: (0, 0)),              # cross Q b
        pl.BlockSpec((Dm, Dm), lambda i: (0, 0)),             # cross out W
        pl.BlockSpec((1, Dm), lambda i: (0, 0)),              # cross out b
        pl.BlockSpec((Dm, FF), lambda i: (0, 0)),             # ffn W1
        pl.BlockSpec((1, FF), lambda i: (0, 0)),              # ffn b1
        pl.BlockSpec((FF, Dm), lambda i: (0, 0)),             # ffn W2
        pl.BlockSpec((1, Dm), lambda i: (0, 0)),              # ffn b2
    ]
    out_spec = pl.BlockSpec((b_blk, T, Dm), lambda i: (i, 0, 0))

    # Advisory cost estimate for XLA's scheduler.
    mm_flops = 2 * B_pad * (
        T * Dm * 3 * Dm            # self-attn fused KVQ
        + 2 * T * T * Dm           # self-attn scores + context
        + T * Dm * Dm              # self-attn out proj
        + S * Dm * 2 * Dm          # cross-attn fused KV
        + T * Dm * Dm              # cross-attn Q
        + 2 * T * S * Dm           # cross-attn scores + context
        + T * Dm * Dm              # cross-attn out proj
        + 2 * T * Dm * FF)         # FFN (two matmuls)
    transcendentals = B_pad * (H * T * T + H * T * S + 8 * T)
    weight_bytes = 4 * (2 * 3 * Dm + Dm * 3 * Dm + 3 * Dm + Dm * Dm + Dm
                        + Dm * 2 * Dm + 2 * Dm + 2 * (Dm * Dm + Dm)
                        + Dm * FF + FF + FF * Dm + Dm)
    io_bytes = 4 * (2 * B_pad * T * Dm + B_pad * S * Dm
                    + B_pad * T * T + B_pad * S)
    cost = pl.CostEstimate(flops=int(mm_flops),
                           transcendentals=int(transcendentals),
                           bytes_accessed=int(io_bytes + weight_bytes))

    out = pl.pallas_call(
        decoder_layer_kernel,
        out_shape=jax.ShapeDtypeStruct((B_pad, T, Dm), x.dtype),
        grid_spec=pltpu.PrefetchScalarGridSpec(
            num_scalar_prefetch=0,
            grid=(n_blk,),
            in_specs=in_specs,
            out_specs=out_spec,
        ),
        compiler_params=pltpu.CompilerParams(
            dimension_semantics=("parallel",)),
        cost_estimate=cost,
    )(x, memory, trg_mask, src_mask,
      ln_g, ln_b,
      a1_kvq_w, a1_kvq_b, a1_o_w, a1_o_b,
      a2_kv_w, a2_kv_b, a2_q_w, a2_q_b, a2_o_w, a2_o_b,
      ff_w1, ff_b1, ff_w2, ff_b2)
    return out[:B]


# ---------------------------------------------------------------------------
# Pure-JAX reference (mirrors the PyTorch module, exact softmax) for checking.
# ---------------------------------------------------------------------------
def reference_forward(x, memory, src_mask, trg_mask, params):
    (ln_g, ln_b, a1_w, a1_b, a2_w, a2_b, ff_w1, ff_b1, ff_w2, ff_b2) = params

    def layer_norm(t, g, b):
        u = jnp.mean(t, axis=-1, keepdims=True)
        s = jnp.mean((t - u) ** 2, axis=-1, keepdims=True)
        return g * ((t - u) * jax.lax.rsqrt(s + EPS)) + b

    def mha(k_in, v_in, q_in, mask, W, b):
        # W: (4, D, D) stacked [Wk, Wv, Wq, Wo] (in->out), b: (4, D)
        Bn = q_in.shape[0]
        k = jnp.einsum('bsd,de->bse', k_in, W[0]) + b[0]
        v = jnp.einsum('bsd,de->bse', v_in, W[1]) + b[1]
        q = (jnp.einsum('btd,de->bte', q_in, W[2]) + b[2]) / math.sqrt(HD)
        kh = k.reshape(Bn, -1, H, HD)
        vh = v.reshape(Bn, -1, H, HD)
        qh = q.reshape(Bn, -1, H, HD)
        scores = jnp.einsum('bqhd,bkhd->bhqk', qh, kh)
        scores = jnp.where(mask[:, None] > 0, scores, NEG_INF)
        p = jax.nn.softmax(scores, axis=-1)
        ctx = jnp.einsum('bhqk,bkhd->bqhd', p, vh).reshape(Bn, -1, D)
        return jnp.einsum('btd,de->bte', ctx, W[3]) + b[3]

    x_norm = layer_norm(x, ln_g[0], ln_b[0])
    h1 = mha(x_norm, x_norm, x_norm, trg_mask, a1_w, a1_b) + x
    h1_norm = layer_norm(h1, ln_g[1], ln_b[1])
    h2 = mha(memory, memory, h1_norm, src_mask, a2_w, a2_b) + h1
    ff_in = layer_norm(h2, ln_g[2], ln_b[2])
    ff = jnp.maximum(jnp.einsum('btd,df->btf', ff_in, ff_w1) + ff_b1, 0.0)
    ff = jnp.einsum('btf,fd->btd', ff, ff_w2) + ff_b2
    return ff + h2


# ---------------------------------------------------------------------------
if __name__ == "__main__":
    B, T, S = 2, 8, 8

    key = jax.random.PRNGKey(0)
    ks = jax.random.split(key, 16)
    scale = 0.1

    # Deterministic synthetic parameters (module __init__ gives the shapes).
    ln_g = jnp.ones((3, D), jnp.float32) + 0.05 * jax.random.normal(ks[0], (3, D))
    ln_b = 0.05 * jax.random.normal(ks[1], (3, D)).astype(jnp.float32)
    a1_w = (scale * jax.random.normal(ks[2], (4, D, D))).astype(jnp.float32)
    a1_b = (scale * jax.random.normal(ks[3], (4, D))).astype(jnp.float32)
    a2_w = (scale * jax.random.normal(ks[4], (4, D, D))).astype(jnp.float32)
    a2_b = (scale * jax.random.normal(ks[5], (4, D))).astype(jnp.float32)
    ff_w1 = (scale * jax.random.normal(ks[6], (D, FF))).astype(jnp.float32)
    ff_b1 = (scale * jax.random.normal(ks[7], (1, FF))).astype(jnp.float32)
    ff_w2 = (scale * jax.random.normal(ks[8], (FF, D))).astype(jnp.float32)
    ff_b2 = (scale * jax.random.normal(ks[9], (1, D))).astype(jnp.float32)
    params = (ln_g, ln_b, a1_w, a1_b, a2_w, a2_b, ff_w1, ff_b1, ff_w2, ff_b2)

    # Inputs.
    x = jax.random.normal(ks[10], (B, T, D), jnp.float32)
    memory = jax.random.normal(ks[11], (B, S, D), jnp.float32)

    # Causal target mask (1.0 = attend); source mask with a few padded keys.
    trg_mask = jnp.broadcast_to(
        jnp.tril(jnp.ones((T, T), jnp.float32)), (B, T, T))
    src_valid = jnp.array([[S], [S - 2]], jnp.int32)          # per-batch valid lens
    src_mask = (jnp.arange(S)[None, None, :] < src_valid[:, :, None]
                ).astype(jnp.float32)                          # (B, 1, S)

    out = transformer_decoder_layer(x, memory, src_mask, trg_mask, params)
    out = jax.block_until_ready(out)

    ref = reference_forward(x, memory, src_mask, trg_mask, params)
    np.testing.assert_allclose(np.asarray(out), np.asarray(ref),
                               rtol=3e-3, atol=3e-3)
    assert out.shape == (B, T, D)
    print("KERNEL_OK")
</pallas_src>

<mosaic_0001>
module attributes {stable_mosaic.version = 11 : i64} {
  func.func @decoder_layer_kernel(%arg0: i32, %arg1: memref<2x8x32xf32, #tpu.memory_space<vmem>>, %arg2: memref<2x8x32xf32, #tpu.memory_space<vmem>>, %arg3: memref<2x8x8xf32, #tpu.memory_space<vmem>>, %arg4: memref<2x1x8xf32, #tpu.memory_space<vmem>>, %arg5: memref<3x32xf32, #tpu.memory_space<vmem>>, %arg6: memref<3x32xf32, #tpu.memory_space<vmem>>, %arg7: memref<32x96xf32, #tpu.memory_space<vmem>>, %arg8: memref<1x96xf32, #tpu.memory_space<vmem>>, %arg9: memref<32x32xf32, #tpu.memory_space<vmem>>, %arg10: memref<1x32xf32, #tpu.memory_space<vmem>>, %arg11: memref<32x64xf32, #tpu.memory_space<vmem>>, %arg12: memref<1x64xf32, #tpu.memory_space<vmem>>, %arg13: memref<32x32xf32, #tpu.memory_space<vmem>>, %arg14: memref<1x32xf32, #tpu.memory_space<vmem>>, %arg15: memref<32x32xf32, #tpu.memory_space<vmem>>, %arg16: memref<1x32xf32, #tpu.memory_space<vmem>>, %arg17: memref<32x64xf32, #tpu.memory_space<vmem>>, %arg18: memref<1x64xf32, #tpu.memory_space<vmem>>, %arg19: memref<64x32xf32, #tpu.memory_space<vmem>>, %arg20: memref<1x32xf32, #tpu.memory_space<vmem>>, %arg21: memref<2x8x32xf32, #tpu.memory_space<vmem>>) attributes {dimension_semantics = [#tpu.dimension_semantics<parallel>], iteration_bounds = array<i64: 1>, scalar_prefetch = 0 : i64, scratch_operands = 0 : i64, tpu.core_type = #tpu.core_type<tc>, window_params = [{transform_indices = @transform_0, window_bounds = array<i64: 2, 8, 32>}, {transform_indices = @transform_1, window_bounds = array<i64: 2, 8, 32>}, {transform_indices = @transform_2, window_bounds = array<i64: 2, 8, 8>}, {transform_indices = @transform_3, window_bounds = array<i64: 2, 1, 8>}, {pipeline_mode = #tpu.pipeline_mode<synchronous>, transform_indices = @transform_4, window_bounds = array<i64: 3, 32>}, {pipeline_mode = #tpu.pipeline_mode<synchronous>, transform_indices = @transform_5, window_bounds = array<i64: 3, 32>}, {pipeline_mode = #tpu.pipeline_mode<synchronous>, transform_indices = @transform_6, window_bounds = array<i64: 32, 96>}, {pipeline_mode = #tpu.pipeline_mode<synchronous>, transform_indices = @transform_7, window_bounds = array<i64: 1, 96>}, {pipeline_mode = #tpu.pipeline_mode<synchronous>, transform_indices = @transform_8, window_bounds = array<i64: 32, 32>}, {pipeline_mode = #tpu.pipeline_mode<synchronous>, transform_indices = @transform_9, window_bounds = array<i64: 1, 32>}, {pipeline_mode = #tpu.pipeline_mode<synchronous>, transform_indices = @transform_10, window_bounds = array<i64: 32, 64>}, {pipeline_mode = #tpu.pipeline_mode<synchronous>, transform_indices = @transform_11, window_bounds = array<i64: 1, 64>}, {pipeline_mode = #tpu.pipeline_mode<synchronous>, transform_indices = @transform_12, window_bounds = array<i64: 32, 32>}, {pipeline_mode = #tpu.pipeline_mode<synchronous>, transform_indices = @transform_13, window_bounds = array<i64: 1, 32>}, {pipeline_mode = #tpu.pipeline_mode<synchronous>, transform_indices = @transform_14, window_bounds = array<i64: 32, 32>}, {pipeline_mode = #tpu.pipeline_mode<synchronous>, transform_indices = @transform_15, window_bounds = array<i64: 1, 32>}, {pipeline_mode = #tpu.pipeline_mode<synchronous>, transform_indices = @transform_16, window_bounds = array<i64: 32, 64>}, {pipeline_mode = #tpu.pipeline_mode<synchronous>, transform_indices = @transform_17, window_bounds = array<i64: 1, 64>}, {pipeline_mode = #tpu.pipeline_mode<synchronous>, transform_indices = @transform_18, window_bounds = array<i64: 64, 32>}, {pipeline_mode = #tpu.pipeline_mode<synchronous>, transform_indices = @transform_19, window_bounds = array<i64: 1, 32>}, {transform_indices = @transform_20, window_bounds = array<i64: 2, 8, 32>}]} {
    %c0 = arith.constant 0 : index
    %c0_0 = arith.constant 0 : index
    %0 = vector.load %arg5[%c0, %c0_0] : memref<3x32xf32, #tpu.memory_space<vmem>>, vector<3x32xf32>
    %c0_1 = arith.constant 0 : index
    %c0_2 = arith.constant 0 : index
    %1 = vector.load %arg6[%c0_1, %c0_2] : memref<3x32xf32, #tpu.memory_space<vmem>>, vector<3x32xf32>
    %c0_3 = arith.constant 0 : index
    %c0_4 = arith.constant 0 : index
    %c0_5 = arith.constant 0 : index
    %2 = vector.load %arg3[%c0_3, %c0_4, %c0_5] : memref<2x8x8xf32, #tpu.memory_space<vmem>>, vector<2x8x8xf32>
    %cst = arith.constant 0.000000e+00 : f32
    %3 = vector.broadcast %cst : f32 to vector<2x8x8xf32>
    %4 = arith.cmpf ogt, %2, %3 : vector<2x8x8xf32>
    %cst_6 = arith.constant 0.000000e+00 : f32
    %cst_7 = arith.constant -1.000000e+30 : f32
    %5 = vector.broadcast %cst_6 : f32 to vector<2x8x8xf32>
    %6 = vector.broadcast %cst_7 : f32 to vector<2x8x8xf32>
    %7 = arith.select %4, %5, %6 : vector<2x8x8xi1>, vector<2x8x8xf32>
    %c0_8 = arith.constant 0 : index
    %c0_9 = arith.constant 0 : index
    %c0_10 = arith.constant 0 : index
    %8 = vector.load %arg4[%c0_8, %c0_9, %c0_10] : memref<2x1x8xf32, #tpu.memory_space<vmem>>, vector<2x1x8xf32>
    %cst_11 = arith.constant 0.000000e+00 : f32
    %9 = vector.broadcast %cst_11 : f32 to vector<2x1x8xf32>
    %10 = arith.cmpf ogt, %8, %9 : vector<2x1x8xf32>
    %cst_12 = arith.constant 0.000000e+00 : f32
    %cst_13 = arith.constant -1.000000e+30 : f32
    %11 = vector.broadcast %cst_12 : f32 to vector<2x1x8xf32>
    %12 = vector.broadcast %cst_13 : f32 to vector<2x1x8xf32>
    %13 = arith.select %10, %11, %12 : vector<2x1x8xi1>, vector<2x1x8xf32>
    %c0_14 = arith.constant 0 : index
    %c0_15 = arith.constant 0 : index
    %c0_16 = arith.constant 0 : index
    %14 = vector.load %arg1[%c0_14, %c0_15, %c0_16] : memref<2x8x32xf32, #tpu.memory_space<vmem>>, vector<2x8x32xf32>
    %15 = vector.shape_cast %14 : vector<2x8x32xf32> to vector<16x32xf32>
    %16 = vector.extract_strided_slice %0 {offsets = [0, 0], sizes = [1, 32], strides = [1, 1]} : vector<3x32xf32> to vector<1x32xf32>
    %17 = vector.shape_cast %16 : vector<1x32xf32> to vector<32xf32>
    %18 = vector.extract_strided_slice %1 {offsets = [0, 0], sizes = [1, 32], strides = [1, 1]} : vector<3x32xf32> to vector<1x32xf32>
    %19 = vector.shape_cast %18 : vector<1x32xf32> to vector<32xf32>
    %cst_17 = arith.constant dense<0.000000e+00> : vector<16xf32>
    %20 = vector.multi_reduction <add>, %15, %cst_17 [1] : vector<16x32xf32> to vector<16xf32>
    %21 = vector.shape_cast %20 : vector<16xf32> to vector<16x1xf32>
    %cst_18 = arith.constant 3.200000e+01 : f32
    %22 = vector.broadcast %cst_18 : f32 to vector<16x1xf32>
    %23 = arith.divf %21, %22 : vector<16x1xf32>
    %24 = vector.broadcast %23 : vector<16x1xf32> to vector<16x32xf32>
    %25 = arith.subf %15, %24 : vector<16x32xf32>
    %26 = arith.mulf %25, %25 : vector<16x32xf32>
    %cst_19 = arith.constant dense<0.000000e+00> : vector<16xf32>
    %27 = vector.multi_reduction <add>, %26, %cst_19 [1] : vector<16x32xf32> to vector<16xf32>
    %28 = vector.shape_cast %27 : vector<16xf32> to vector<16x1xf32>
    %cst_20 = arith.constant 3.200000e+01 : f32
    %29 = vector.broadcast %cst_20 : f32 to vector<16x1xf32>
    %30 = arith.divf %28, %29 : vector<16x1xf32>
    %31 = vector.broadcast %23 : vector<16x1xf32> to vector<16x32xf32>
    %32 = arith.subf %15, %31 : vector<16x32xf32>
    %cst_21 = arith.constant 9.99999997E-7 : f32
    %33 = vector.broadcast %cst_21 : f32 to vector<16x1xf32>
    %34 = arith.addf %30, %33 : vector<16x1xf32>
    %35 = math.rsqrt %34 : vector<16x1xf32>
    %36 = vector.broadcast %35 : vector<16x1xf32> to vector<16x32xf32>
    %37 = arith.mulf %32, %36 : vector<16x32xf32>
    %38 = vector.shape_cast %17 : vector<32xf32> to vector<1x32xf32>
    %39 = vector.broadcast %38 : vector<1x32xf32> to vector<16x32xf32>
    %40 = arith.mulf %39, %37 : vector<16x32xf32>
    %41 = vector.shape_cast %19 : vector<32xf32> to vector<1x32xf32>
    %42 = vector.broadcast %41 : vector<1x32xf32> to vector<16x32xf32>
    %43 = arith.addf %40, %42 : vector<16x32xf32>
    %c0_22 = arith.constant 0 : index
    %c0_23 = arith.constant 0 : index
    %44 = vector.load %arg7[%c0_22, %c0_23] : memref<32x96xf32, #tpu.memory_space<vmem>>, vector<32x96xf32>
    %cst_24 = arith.constant dense<0.000000e+00> : vector<16x96xf32>
    %45 = tpu.matmul %43, %44, %cst_24 {dimension_numbers = #tpu.dot_dimension_numbers<[1], [0], [0], [1], [0, 0, 1, 1], [], []>} : vector<16x32xf32>, vector<32x96xf32>, vector<16x96xf32> -> vector<16x96xf32>
    %c0_25 = arith.constant 0 : index
    %c0_26 = arith.constant 0 : index
    %46 = vector.load %arg8[%c0_25, %c0_26] : memref<1x96xf32, #tpu.memory_space<vmem>>, vector<1x96xf32>
    %47 = vector.broadcast %46 : vector<1x96xf32> to vector<16x96xf32>
    %48 = arith.addf %45, %47 : vector<16x96xf32>
    %49 = vector.extract_strided_slice %48 {offsets = [0, 0], sizes = [16, 32], strides = [1, 1]} : vector<16x96xf32> to vector<16x32xf32>
    %50 = vector.shape_cast %49 : vector<16x32xf32> to vector<2x8x32xf32>
    %51 = vector.extract_strided_slice %48 {offsets = [0, 32], sizes = [16, 32], strides = [1, 1]} : vector<16x96xf32> to vector<16x32xf32>
    %52 = vector.shape_cast %51 : vector<16x32xf32> to vector<2x8x32xf32>
    %53 = vector.extract_strided_slice %48 {offsets = [0, 64], sizes = [16, 32], strides = [1, 1]} : vector<16x96xf32> to vector<16x32xf32>
    %cst_27 = arith.constant 0.353553385 : f32
    %54 = vector.broadcast %cst_27 : f32 to vector<16x32xf32>
    %55 = arith.mulf %53, %54 : vector<16x32xf32>
    %56 = vector.shape_cast %55 : vector<16x32xf32> to vector<2x8x32xf32>
    %57 = vector.extract_strided_slice %56 {offsets = [0, 0, 0], sizes = [2, 8, 8], strides = [1, 1, 1]} : vector<2x8x32xf32> to vector<2x8x8xf32>
    %58 = vector.extract_strided_slice %50 {offsets = [0, 0, 0], sizes = [2, 8, 8], strides = [1, 1, 1]} : vector<2x8x32xf32> to vector<2x8x8xf32>
    "tpu.trace_start"() <{level = 10 : i32, message = "bqd,bkd->bqk"}> : () -> ()
    %cst_28 = arith.constant dense<0.000000e+00> : vector<2x8x8xf32>
    %59 = tpu.matmul %57, %58, %cst_28 {dimension_numbers = #tpu.dot_dimension_numbers<[2], [2], [1], [1], [0, 0, 0, 1, 1, 1], [0], [0]>} : vector<2x8x8xf32>, vector<2x8x8xf32>, vector<2x8x8xf32> -> vector<2x8x8xf32>
    "tpu.trace_stop"() : () -> ()
    %60 = arith.addf %59, %7 : vector<2x8x8xf32>
    %cst_29 = arith.constant dense<0xFF800000> : vector<2x8xf32>
    %61 = vector.multi_reduction <maximumf>, %60, %cst_29 [2] : vector<2x8x8xf32> to vector<2x8xf32>
    %62 = vector.shape_cast %61 : vector<2x8xf32> to vector<2x8x1xf32>
    %63 = vector.broadcast %62 : vector<2x8x1xf32> to vector<2x8x8xf32>
    %64 = arith.subf %60, %63 : vector<2x8x8xf32>
    %65 = math.exp %64 : vector<2x8x8xf32>
    %cst_30 = arith.constant dense<0.000000e+00> : vector<2x8xf32>
    %66 = vector.multi_reduction <add>, %65, %cst_30 [2] : vector<2x8x8xf32> to vector<2x8xf32>
    %67 = vector.shape_cast %66 : vector<2x8xf32> to vector<2x8x1xf32>
    %68 = tpu.reciprocal %67 {approx = true} : vector<2x8x1xf32> -> vector<2x8x1xf32>
    %69 = vector.broadcast %68 : vector<2x8x1xf32> to vector<2x8x8xf32>
    %70 = arith.mulf %65, %69 : vector<2x8x8xf32>
    %71 = vector.extract_strided_slice %52 {offsets = [0, 0, 0], sizes = [2, 8, 8], strides = [1, 1, 1]} : vector<2x8x32xf32> to vector<2x8x8xf32>
    "tpu.trace_start"() <{level = 10 : i32, message = "bqk,bkd->bqd"}> : () -> ()
    %cst_31 = arith.constant dense<0.000000e+00> : vector<2x8x8xf32>
    %72 = tpu.matmul %70, %71, %cst_31 {dimension_numbers = #tpu.dot_dimension_numbers<[2], [1], [1], [2], [0, 0, 0, 1, 1, 2], [0], [0]>} : vector<2x8x8xf32>, vector<2x8x8xf32>, vector<2x8x8xf32> -> vector<2x8x8xf32>
    "tpu.trace_stop"() : () -> ()
    %73 = vector.extract_strided_slice %56 {offsets = [0, 0, 8], sizes = [2, 8, 8], strides = [1, 1, 1]} : vector<2x8x32xf32> to vector<2x8x8xf32>
    %74 = vector.extract_strided_slice %50 {offsets = [0, 0, 8], sizes = [2, 8, 8], strides = [1, 1, 1]} : vector<2x8x32xf32> to vector<2x8x8xf32>
    "tpu.trace_start"() <{level = 10 : i32, message = "bqd,bkd->bqk"}> : () -> ()
    %cst_32 = arith.constant dense<0.000000e+00> : vector<2x8x8xf32>
    %75 = tpu.matmul %73, %74, %cst_32 {dimension_numbers = #tpu.dot_dimension_numbers<[2], [2], [1], [1], [0, 0, 0, 1, 1, 1], [0], [0]>} : vector<2x8x8xf32>, vector<2x8x8xf32>, vector<2x8x8xf32> -> vector<2x8x8xf32>
    "tpu.trace_stop"() : () -> ()
    %76 = arith.addf %75, %7 : vector<2x8x8xf32>
    %cst_33 = arith.constant dense<0xFF800000> : vector<2x8xf32>
    %77 = vector.multi_reduction <maximumf>, %76, %cst_33 [2] : vector<2x8x8xf32> to vector<2x8xf32>
    %78 = vector.shape_cast %77 : vector<2x8xf32> to vector<2x8x1xf32>
    %79 = vector.broadcast %78 : vector<2x8x1xf32> to vector<2x8x8xf32>
    %80 = arith.subf %76, %79 : vector<2x8x8xf32>
    %81 = math.exp %80 : vector<2x8x8xf32>
    %cst_34 = arith.constant dense<0.000000e+00> : vector<2x8xf32>
    %82 = vector.multi_reduction <add>, %81, %cst_34 [2] : vector<2x8x8xf32> to vector<2x8xf32>
    %83 = vector.shape_cast %82 : vector<2x8xf32> to vector<2x8x1xf32>
    %84 = tpu.reciprocal %83 {approx = true} : vector<2x8x1xf32> -> vector<2x8x1xf32>
    %85 = vector.broadcast %84 : vector<2x8x1xf32> to vector<2x8x8xf32>
    %86 = arith.mulf %81, %85 : vector<2x8x8xf32>
    %87 = vector.extract_strided_slice %52 {offsets = [0, 0, 8], sizes = [2, 8, 8], strides = [1, 1, 1]} : vector<2x8x32xf32> to vector<2x8x8xf32>
    "tpu.trace_start"() <{level = 10 : i32, message = "bqk,bkd->bqd"}> : () -> ()
    %cst_35 = arith.constant dense<0.000000e+00> : vector<2x8x8xf32>
    %88 = tpu.matmul %86, %87, %cst_35 {dimension_numbers = #tpu.dot_dimension_numbers<[2], [1], [1], [2], [0, 0, 0, 1, 1, 2], [0], [0]>} : vector<2x8x8xf32>, vector<2x8x8xf32>, vector<2x8x8xf32> -> vector<2x8x8xf32>
    "tpu.trace_stop"() : () -> ()
    %89 = vector.extract_strided_slice %56 {offsets = [0, 0, 16], sizes = [2, 8, 8], strides = [1, 1, 1]} : vector<2x8x32xf32> to vector<2x8x8xf32>
    %90 = vector.extract_strided_slice %50 {offsets = [0, 0, 16], sizes = [2, 8, 8], strides = [1, 1, 1]} : vector<2x8x32xf32> to vector<2x8x8xf32>
    "tpu.trace_start"() <{level = 10 : i32, message = "bqd,bkd->bqk"}> : () -> ()
    %cst_36 = arith.constant dense<0.000000e+00> : vector<2x8x8xf32>
    %91 = tpu.matmul %89, %90, %cst_36 {dimension_numbers = #tpu.dot_dimension_numbers<[2], [2], [1], [1], [0, 0, 0, 1, 1, 1], [0], [0]>} : vector<2x8x8xf32>, vector<2x8x8xf32>, vector<2x8x8xf32> -> vector<2x8x8xf32>
    "tpu.trace_stop"() : () -> ()
    %92 = arith.addf %91, %7 : vector<2x8x8xf32>
    %cst_37 = arith.constant dense<0xFF800000> : vector<2x8xf32>
    %93 = vector.multi_reduction <maximumf>, %92, %cst_37 [2] : vector<2x8x8xf32> to vector<2x8xf32>
    %94 = vector.shape_cast %93 : vector<2x8xf32> to vector<2x8x1xf32>
    %95 = vector.broadcast %94 : vector<2x8x1xf32> to vector<2x8x8xf32>
    %96 = arith.subf %92, %95 : vector<2x8x8xf32>
    %97 = math.exp %96 : vector<2x8x8xf32>
    %cst_38 = arith.constant dense<0.000000e+00> : vector<2x8xf32>
    %98 = vector.multi_reduction <add>, %97, %cst_38 [2] : vector<2x8x8xf32> to vector<2x8xf32>
    %99 = vector.shape_cast %98 : vector<2x8xf32> to vector<2x8x1xf32>
    %100 = tpu.reciprocal %99 {approx = true} : vector<2x8x1xf32> -> vector<2x8x1xf32>
    %101 = vector.broadcast %100 : vector<2x8x1xf32> to vector<2x8x8xf32>
    %102 = arith.mulf %97, %101 : vector<2x8x8xf32>
    %103 = vector.extract_strided_slice %52 {offsets = [0, 0, 16], sizes = [2, 8, 8], strides = [1, 1, 1]} : vector<2x8x32xf32> to vector<2x8x8xf32>
    "tpu.trace_start"() <{level = 10 : i32, message = "bqk,bkd->bqd"}> : () -> ()
    %cst_39 = arith.constant dense<0.000000e+00> : vector<2x8x8xf32>
    %104 = tpu.matmul %102, %103, %cst_39 {dimension_numbers = #tpu.dot_dimension_numbers<[2], [1], [1], [2], [0, 0, 0, 1, 1, 2], [0], [0]>} : vector<2x8x8xf32>, vector<2x8x8xf32>, vector<2x8x8xf32> -> vector<2x8x8xf32>
    "tpu.trace_stop"() : () -> ()
    %105 = vector.extract_strided_slice %56 {offsets = [0, 0, 24], sizes = [2, 8, 8], strides = [1, 1, 1]} : vector<2x8x32xf32> to vector<2x8x8xf32>
    %106 = vector.extract_strided_slice %50 {offsets = [0, 0, 24], sizes = [2, 8, 8], strides = [1, 1, 1]} : vector<2x8x32xf32> to vector<2x8x8xf32>
    "tpu.trace_start"() <{level = 10 : i32, message = "bqd,bkd->bqk"}> : () -> ()
    %cst_40 = arith.constant dense<0.000000e+00> : vector<2x8x8xf32>
    %107 = tpu.matmul %105, %106, %cst_40 {dimension_numbers = #tpu.dot_dimension_numbers<[2], [2], [1], [1], [0, 0, 0, 1, 1, 1], [0], [0]>} : vector<2x8x8xf32>, vector<2x8x8xf32>, vector<2x8x8xf32> -> vector<2x8x8xf32>
    "tpu.trace_stop"() : () -> ()
    %108 = arith.addf %107, %7 : vector<2x8x8xf32>
    %cst_41 = arith.constant dense<0xFF800000> : vector<2x8xf32>
    %109 = vector.multi_reduction <maximumf>, %108, %cst_41 [2] : vector<2x8x8xf32> to vector<2x8xf32>
    %110 = vector.shape_cast %109 : vector<2x8xf32> to vector<2x8x1xf32>
    %111 = vector.broadcast %110 : vector<2x8x1xf32> to vector<2x8x8xf32>
    %112 = arith.subf %108, %111 : vector<2x8x8xf32>
    %113 = math.exp %112 : vector<2x8x8xf32>
    %cst_42 = arith.constant dense<0.000000e+00> : vector<2x8xf32>
    %114 = vector.multi_reduction <add>, %113, %cst_42 [2] : vector<2x8x8xf32> to vector<2x8xf32>
    %115 = vector.shape_cast %114 : vector<2x8xf32> to vector<2x8x1xf32>
    %116 = tpu.reciprocal %115 {approx = true} : vector<2x8x1xf32> -> vector<2x8x1xf32>
    %117 = vector.broadcast %116 : vector<2x8x1xf32> to vector<2x8x8xf32>
    %118 = arith.mulf %113, %117 : vector<2x8x8xf32>
    %119 = vector.extract_strided_slice %52 {offsets = [0, 0, 24], sizes = [2, 8, 8], strides = [1, 1, 1]} : vector<2x8x32xf32> to vector<2x8x8xf32>
    "tpu.trace_start"() <{level = 10 : i32, message = "bqk,bkd->bqd"}> : () -> ()
    %cst_43 = arith.constant dense<0.000000e+00> : vector<2x8x8xf32>
    %120 = tpu.matmul %118, %119, %cst_43 {dimension_numbers = #tpu.dot_dimension_numbers<[2], [1], [1], [2], [0, 0, 0, 1, 1, 2], [0], [0]>} : vector<2x8x8xf32>, vector<2x8x8xf32>, vector<2x8x8xf32> -> vector<2x8x8xf32>
    "tpu.trace_stop"() : () -> ()
    %121 = tpu.concatenate %72, %88, %104, %120 in 2 : vector<2x8x8xf32>, vector<2x8x8xf32>, vector<2x8x8xf32>, vector<2x8x8xf32> -> vector<2x8x32xf32>
    %122 = vector.shape_cast %121 : vector<2x8x32xf32> to vector<16x32xf32>
    %c0_44 = arith.constant 0 : index
    %c0_45 = arith.constant 0 : index
    %123 = vector.load %arg9[%c0_44, %c0_45] : memref<32x32xf32, #tpu.memory_space<vmem>>, vector<32x32xf32>
    %cst_46 = arith.constant dense<0.000000e+00> : vector<16x32xf32>
    %124 = tpu.matmul %122, %123, %cst_46 {dimension_numbers = #tpu.dot_dimension_numbers<[1], [0], [0], [1], [0, 0, 1, 1], [], []>} : vector<16x32xf32>, vector<32x32xf32>, vector<16x32xf32> -> vector<16x32xf32>
    %c0_47 = arith.constant 0 : index
    %c0_48 = arith.constant 0 : index
    %125 = vector.load %arg10[%c0_47, %c0_48] : memref<1x32xf32, #tpu.memory_space<vmem>>, vector<1x32xf32>
    %126 = vector.broadcast %125 : vector<1x32xf32> to vector<16x32xf32>
    %127 = arith.addf %124, %126 : vector<16x32xf32>
    %128 = arith.addf %127, %15 : vector<16x32xf32>
    %129 = vector.extract_strided_slice %0 {offsets = [1, 0], sizes = [1, 32], strides = [1, 1]} : vector<3x32xf32> to vector<1x32xf32>
    %130 = vector.shape_cast %129 : vector<1x32xf32> to vector<32xf32>
    %131 = vector.extract_strided_slice %1 {offsets = [1, 0], sizes = [1, 32], strides = [1, 1]} : vector<3x32xf32> to vector<1x32xf32>
    %132 = vector.shape_cast %131 : vector<1x32xf32> to vector<32xf32>
    %cst_49 = arith.constant dense<0.000000e+00> : vector<16xf32>
    %133 = vector.multi_reduction <add>, %128, %cst_49 [1] : vector<16x32xf32> to vector<16xf32>
    %134 = vector.shape_cast %133 : vector<16xf32> to vector<16x1xf32>
    %cst_50 = arith.constant 3.200000e+01 : f32
    %135 = vector.broadcast %cst_50 : f32 to vector<16x1xf32>
    %136 = arith.divf %134, %135 : vector<16x1xf32>
    %137 = vector.broadcast %136 : vector<16x1xf32> to vector<16x32xf32>
    %138 = arith.subf %128, %137 : vector<16x32xf32>
    %139 = arith.mulf %138, %138 : vector<16x32xf32>
    %cst_51 = arith.constant dense<0.000000e+00> : vector<16xf32>
    %140 = vector.multi_reduction <add>, %139, %cst_51 [1] : vector<16x32xf32> to vector<16xf32>
    %141 = vector.shape_cast %140 : vector<16xf32> to vector<16x1xf32>
    %cst_52 = arith.constant 3.200000e+01 : f32
    %142 = vector.broadcast %cst_52 : f32 to vector<16x1xf32>
    %143 = arith.divf %141, %142 : vector<16x1xf32>
    %144 = vector.broadcast %136 : vector<16x1xf32> to vector<16x32xf32>
    %145 = arith.subf %128, %144 : vector<16x32xf32>
    %cst_53 = arith.constant 9.99999997E-7 : f32
    %146 = vector.broadcast %cst_53 : f32 to vector<16x1xf32>
    %147 = arith.addf %143, %146 : vector<16x1xf32>
    %148 = math.rsqrt %147 : vector<16x1xf32>
    %149 = vector.broadcast %148 : vector<16x1xf32> to vector<16x32xf32>
    %150 = arith.mulf %145, %149 : vector<16x32xf32>
    %151 = vector.shape_cast %130 : vector<32xf32> to vector<1x32xf32>
    %152 = vector.broadcast %151 : vector<1x32xf32> to vector<16x32xf32>
    %153 = arith.mulf %152, %150 : vector<16x32xf32>
    %154 = vector.shape_cast %132 : vector<32xf32> to vector<1x32xf32>
    %155 = vector.broadcast %154 : vector<1x32xf32> to vector<16x32xf32>
    %156 = arith.addf %153, %155 : vector<16x32xf32>
    %c0_54 = arith.constant 0 : index
    %c0_55 = arith.constant 0 : index
    %c0_56 = arith.constant 0 : index
    %157 = vector.load %arg2[%c0_54, %c0_55, %c0_56] : memref<2x8x32xf32, #tpu.memory_space<vmem>>, vector<2x8x32xf32>
    %158 = vector.shape_cast %157 : vector<2x8x32xf32> to vector<16x32xf32>
    %c0_57 = arith.constant 0 : index
    %c0_58 = arith.constant 0 : index
    %159 = vector.load %arg11[%c0_57, %c0_58] : memref<32x64xf32, #tpu.memory_space<vmem>>, vector<32x64xf32>
    %cst_59 = arith.constant dense<0.000000e+00> : vector<16x64xf32>
    %160 = tpu.matmul %158, %159, %cst_59 {dimension_numbers = #tpu.dot_dimension_numbers<[1], [0], [0], [1], [0, 0, 1, 1], [], []>} : vector<16x32xf32>, vector<32x64xf32>, vector<16x64xf32> -> vector<16x64xf32>
    %c0_60 = arith.constant 0 : index
    %c0_61 = arith.constant 0 : index
    %161 = vector.load %arg12[%c0_60, %c0_61] : memref<1x64xf32, #tpu.memory_space<vmem>>, vector<1x64xf32>
    %162 = vector.broadcast %161 : vector<1x64xf32> to vector<16x64xf32>
    %163 = arith.addf %160, %162 : vector<16x64xf32>
    %164 = vector.extract_strided_slice %163 {offsets = [0, 0], sizes = [16, 32], strides = [1, 1]} : vector<16x64xf32> to vector<16x32xf32>
    %165 = vector.shape_cast %164 : vector<16x32xf32> to vector<2x8x32xf32>
    %166 = vector.extract_strided_slice %163 {offsets = [0, 32], sizes = [16, 32], strides = [1, 1]} : vector<16x64xf32> to vector<16x32xf32>
    %167 = vector.shape_cast %166 : vector<16x32xf32> to vector<2x8x32xf32>
    %c0_62 = arith.constant 0 : index
    %c0_63 = arith.constant 0 : index
    %168 = vector.load %arg13[%c0_62, %c0_63] : memref<32x32xf32, #tpu.memory_space<vmem>>, vector<32x32xf32>
    %cst_64 = arith.constant dense<0.000000e+00> : vector<16x32xf32>
    %169 = tpu.matmul %156, %168, %cst_64 {dimension_numbers = #tpu.dot_dimension_numbers<[1], [0], [0], [1], [0, 0, 1, 1], [], []>} : vector<16x32xf32>, vector<32x32xf32>, vector<16x32xf32> -> vector<16x32xf32>
    %c0_65 = arith.constant 0 : index
    %c0_66 = arith.constant 0 : index
    %170 = vector.load %arg14[%c0_65, %c0_66] : memref<1x32xf32, #tpu.memory_space<vmem>>, vector<1x32xf32>
    %171 = vector.broadcast %170 : vector<1x32xf32> to vector<16x32xf32>
    %172 = arith.addf %169, %171 : vector<16x32xf32>
    %cst_67 = arith.constant 0.353553385 : f32
    %173 = vector.broadcast %cst_67 : f32 to vector<16x32xf32>
    %174 = arith.mulf %172, %173 : vector<16x32xf32>
    %175 = vector.shape_cast %174 : vector<16x32xf32> to vector<2x8x32xf32>
    %176 = vector.extract_strided_slice %175 {offsets = [0, 0, 0], sizes = [2, 8, 8], strides = [1, 1, 1]} : vector<2x8x32xf32> to vector<2x8x8xf32>
    %177 = vector.extract_strided_slice %165 {offsets = [0, 0, 0], sizes = [2, 8, 8], strides = [1, 1, 1]} : vector<2x8x32xf32> to vector<2x8x8xf32>
    "tpu.trace_start"() <{level = 10 : i32, message = "bqd,bkd->bqk"}> : () -> ()
    %cst_68 = arith.constant dense<0.000000e+00> : vector<2x8x8xf32>
    %178 = tpu.matmul %176, %177, %cst_68 {dimension_numbers = #tpu.dot_dimension_numbers<[2], [2], [1], [1], [0, 0, 0, 1, 1, 1], [0], [0]>} : vector<2x8x8xf32>, vector<2x8x8xf32>, vector<2x8x8xf32> -> vector<2x8x8xf32>
    "tpu.trace_stop"() : () -> ()
    %179 = vector.broadcast %13 : vector<2x1x8xf32> to vector<2x8x8xf32>
    %180 = arith.addf %178, %179 : vector<2x8x8xf32>
    %cst_69 = arith.constant dense<0xFF800000> : vector<2x8xf32>
    %181 = vector.multi_reduction <maximumf>, %180, %cst_69 [2] : vector<2x8x8xf32> to vector<2x8xf32>
    %182 = vector.shape_cast %181 : vector<2x8xf32> to vector<2x8x1xf32>
    %183 = vector.broadcast %182 : vector<2x8x1xf32> to vector<2x8x8xf32>
    %184 = arith.subf %180, %183 : vector<2x8x8xf32>
    %185 = math.exp %184 : vector<2x8x8xf32>
    %cst_70 = arith.constant dense<0.000000e+00> : vector<2x8xf32>
    %186 = vector.multi_reduction <add>, %185, %cst_70 [2] : vector<2x8x8xf32> to vector<2x8xf32>
    %187 = vector.shape_cast %186 : vector<2x8xf32> to vector<2x8x1xf32>
    %188 = tpu.reciprocal %187 {approx = true} : vector<2x8x1xf32> -> vector<2x8x1xf32>
    %189 = vector.broadcast %188 : vector<2x8x1xf32> to vector<2x8x8xf32>
    %190 = arith.mulf %185, %189 : vector<2x8x8xf32>
    %191 = vector.extract_strided_slice %167 {offsets = [0, 0, 0], sizes = [2, 8, 8], strides = [1, 1, 1]} : vector<2x8x32xf32> to vector<2x8x8xf32>
    "tpu.trace_start"() <{level = 10 : i32, message = "bqk,bkd->bqd"}> : () -> ()
    %cst_71 = arith.constant dense<0.000000e+00> : vector<2x8x8xf32>
    %192 = tpu.matmul %190, %191, %cst_71 {dimension_numbers = #tpu.dot_dimension_numbers<[2], [1], [1], [2], [0, 0, 0, 1, 1, 2], [0], [0]>} : vector<2x8x8xf32>, vector<2x8x8xf32>, vector<2x8x8xf32> -> vector<2x8x8xf32>
    "tpu.trace_stop"() : () -> ()
    %193 = vector.extract_strided_slice %175 {offsets = [0, 0, 8], sizes = [2, 8, 8], strides = [1, 1, 1]} : vector<2x8x32xf32> to vector<2x8x8xf32>
    %194 = vector.extract_strided_slice %165 {offsets = [0, 0, 8], sizes = [2, 8, 8], strides = [1, 1, 1]} : vector<2x8x32xf32> to vector<2x8x8xf32>
    "tpu.trace_start"() <{level = 10 : i32, message = "bqd,bkd->bqk"}> : () -> ()
    %cst_72 = arith.constant dense<0.000000e+00> : vector<2x8x8xf32>
    %195 = tpu.matmul %193, %194, %cst_72 {dimension_numbers = #tpu.dot_dimension_numbers<[2], [2], [1], [1], [0, 0, 0, 1, 1, 1], [0], [0]>} : vector<2x8x8xf32>, vector<2x8x8xf32>, vector<2x8x8xf32> -> vector<2x8x8xf32>
    "tpu.trace_stop"() : () -> ()
    %196 = vector.broadcast %13 : vector<2x1x8xf32> to vector<2x8x8xf32>
    %197 = arith.addf %195, %196 : vector<2x8x8xf32>
    %cst_73 = arith.constant dense<0xFF800000> : vector<2x8xf32>
    %198 = vector.multi_reduction <maximumf>, %197, %cst_73 [2] : vector<2x8x8xf32> to vector<2x8xf32>
    %199 = vector.shape_cast %198 : vector<2x8xf32> to vector<2x8x1xf32>
    %200 = vector.broadcast %199 : vector<2x8x1xf32> to vector<2x8x8xf32>
    %201 = arith.subf %197, %200 : vector<2x8x8xf32>
    %202 = math.exp %201 : vector<2x8x8xf32>
    %cst_74 = arith.constant dense<0.000000e+00> : vector<2x8xf32>
    %203 = vector.multi_reduction <add>, %202, %cst_74 [2] : vector<2x8x8xf32> to vector<2x8xf32>
    %204 = vector.shape_cast %203 : vector<2x8xf32> to vector<2x8x1xf32>
    %205 = tpu.reciprocal %204 {approx = true} : vector<2x8x1xf32> -> vector<2x8x1xf32>
    %206 = vector.broadcast %205 : vector<2x8x1xf32> to vector<2x8x8xf32>
    %207 = arith.mulf %202, %206 : vector<2x8x8xf32>
    %208 = vector.extract_strided_slice %167 {offsets = [0, 0, 8], sizes = [2, 8, 8], strides = [1, 1, 1]} : vector<2x8x32xf32> to vector<2x8x8xf32>
    "tpu.trace_start"() <{level = 10 : i32, message = "bqk,bkd->bqd"}> : () -> ()
    %cst_75 = arith.constant dense<0.000000e+00> : vector<2x8x8xf32>
    %209 = tpu.matmul %207, %208, %cst_75 {dimension_numbers = #tpu.dot_dimension_numbers<[2], [1], [1], [2], [0, 0, 0, 1, 1, 2], [0], [0]>} : vector<2x8x8xf32>, vector<2x8x8xf32>, vector<2x8x8xf32> -> vector<2x8x8xf32>
    "tpu.trace_stop"() : () -> ()
    %210 = vector.extract_strided_slice %175 {offsets = [0, 0, 16], sizes = [2, 8, 8], strides = [1, 1, 1]} : vector<2x8x32xf32> to vector<2x8x8xf32>
    %211 = vector.extract_strided_slice %165 {offsets = [0, 0, 16], sizes = [2, 8, 8], strides = [1, 1, 1]} : vector<2x8x32xf32> to vector<2x8x8xf32>
    "tpu.trace_start"() <{level = 10 : i32, message = "bqd,bkd->bqk"}> : () -> ()
    %cst_76 = arith.constant dense<0.000000e+00> : vector<2x8x8xf32>
    %212 = tpu.matmul %210, %211, %cst_76 {dimension_numbers = #tpu.dot_dimension_numbers<[2], [2], [1], [1], [0, 0, 0, 1, 1, 1], [0], [0]>} : vector<2x8x8xf32>, vector<2x8x8xf32>, vector<2x8x8xf32> -> vector<2x8x8xf32>
    "tpu.trace_stop"() : () -> ()
    %213 = vector.broadcast %13 : vector<2x1x8xf32> to vector<2x8x8xf32>
    %214 = arith.addf %212, %213 : vector<2x8x8xf32>
    %cst_77 = arith.constant dense<0xFF800000> : vector<2x8xf32>
    %215 = vector.multi_reduction <maximumf>, %214, %cst_77 [2] : vector<2x8x8xf32> to vector<2x8xf32>
    %216 = vector.shape_cast %215 : vector<2x8xf32> to vector<2x8x1xf32>
    %217 = vector.broadcast %216 : vector<2x8x1xf32> to vector<2x8x8xf32>
    %218 = arith.subf %214, %217 : vector<2x8x8xf32>
    %219 = math.exp %218 : vector<2x8x8xf32>
    %cst_78 = arith.constant dense<0.000000e+00> : vector<2x8xf32>
    %220 = vector.multi_reduction <add>, %219, %cst_78 [2] : vector<2x8x8xf32> to vector<2x8xf32>
    %221 = vector.shape_cast %220 : vector<2x8xf32> to vector<2x8x1xf32>
    %222 = tpu.reciprocal %221 {approx = true} : vector<2x8x1xf32> -> vector<2x8x1xf32>
    %223 = vector.broadcast %222 : vector<2x8x1xf32> to vector<2x8x8xf32>
    %224 = arith.mulf %219, %223 : vector<2x8x8xf32>
    %225 = vector.extract_strided_slice %167 {offsets = [0, 0, 16], sizes = [2, 8, 8], strides = [1, 1, 1]} : vector<2x8x32xf32> to vector<2x8x8xf32>
    "tpu.trace_start"() <{level = 10 : i32, message = "bqk,bkd->bqd"}> : () -> ()
    %cst_79 = arith.constant dense<0.000000e+00> : vector<2x8x8xf32>
    %226 = tpu.matmul %224, %225, %cst_79 {dimension_numbers = #tpu.dot_dimension_numbers<[2], [1], [1], [2], [0, 0, 0, 1, 1, 2], [0], [0]>} : vector<2x8x8xf32>, vector<2x8x8xf32>, vector<2x8x8xf32> -> vector<2x8x8xf32>
    "tpu.trace_stop"() : () -> ()
    %227 = vector.extract_strided_slice %175 {offsets = [0, 0, 24], sizes = [2, 8, 8], strides = [1, 1, 1]} : vector<2x8x32xf32> to vector<2x8x8xf32>
    %228 = vector.extract_strided_slice %165 {offsets = [0, 0, 24], sizes = [2, 8, 8], strides = [1, 1, 1]} : vector<2x8x32xf32> to vector<2x8x8xf32>
    "tpu.trace_start"() <{level = 10 : i32, message = "bqd,bkd->bqk"}> : () -> ()
    %cst_80 = arith.constant dense<0.000000e+00> : vector<2x8x8xf32>
    %229 = tpu.matmul %227, %228, %cst_80 {dimension_numbers = #tpu.dot_dimension_numbers<[2], [2], [1], [1], [0, 0, 0, 1, 1, 1], [0], [0]>} : vector<2x8x8xf32>, vector<2x8x8xf32>, vector<2x8x8xf32> -> vector<2x8x8xf32>
    "tpu.trace_stop"() : () -> ()
    %230 = vector.broadcast %13 : vector<2x1x8xf32> to vector<2x8x8xf32>
    %231 = arith.addf %229, %230 : vector<2x8x8xf32>
    %cst_81 = arith.constant dense<0xFF800000> : vector<2x8xf32>
    %232 = vector.multi_reduction <maximumf>, %231, %cst_81 [2] : vector<2x8x8xf32> to vector<2x8xf32>
    %233 = vector.shape_cast %232 : vector<2x8xf32> to vector<2x8x1xf32>
    %234 = vector.broadcast %233 : vector<2x8x1xf32> to vector<2x8x8xf32>
    %235 = arith.subf %231, %234 : vector<2x8x8xf32>
    %236 = math.exp %235 : vector<2x8x8xf32>
    %cst_82 = arith.constant dense<0.000000e+00> : vector<2x8xf32>
    %237 = vector.multi_reduction <add>, %236, %cst_82 [2] : vector<2x8x8xf32> to vector<2x8xf32>
    %238 = vector.shape_cast %237 : vector<2x8xf32> to vector<2x8x1xf32>
    %239 = tpu.reciprocal %238 {approx = true} : vector<2x8x1xf32> -> vector<2x8x1xf32>
    %240 = vector.broadcast %239 : vector<2x8x1xf32> to vector<2x8x8xf32>
    %241 = arith.mulf %236, %240 : vector<2x8x8xf32>
    %242 = vector.extract_strided_slice %167 {offsets = [0, 0, 24], sizes = [2, 8, 8], strides = [1, 1, 1]} : vector<2x8x32xf32> to vector<2x8x8xf32>
    "tpu.trace_start"() <{level = 10 : i32, message = "bqk,bkd->bqd"}> : () -> ()
    %cst_83 = arith.constant dense<0.000000e+00> : vector<2x8x8xf32>
    %243 = tpu.matmul %241, %242, %cst_83 {dimension_numbers = #tpu.dot_dimension_numbers<[2], [1], [1], [2], [0, 0, 0, 1, 1, 2], [0], [0]>} : vector<2x8x8xf32>, vector<2x8x8xf32>, vector<2x8x8xf32> -> vector<2x8x8xf32>
    "tpu.trace_stop"() : () -> ()
    %244 = tpu.concatenate %192, %209, %226, %243 in 2 : vector<2x8x8xf32>, vector<2x8x8xf32>, vector<2x8x8xf32>, vector<2x8x8xf32> -> vector<2x8x32xf32>
    %245 = vector.shape_cast %244 : vector<2x8x32xf32> to vector<16x32xf32>
    %c0_84 = arith.constant 0 : index
    %c0_85 = arith.constant 0 : index
    %246 = vector.load %arg15[%c0_84, %c0_85] : memref<32x32xf32, #tpu.memory_space<vmem>>, vector<32x32xf32>
    %cst_86 = arith.constant dense<0.000000e+00> : vector<16x32xf32>
    %247 = tpu.matmul %245, %246, %cst_86 {dimension_numbers = #tpu.dot_dimension_numbers<[1], [0], [0], [1], [0, 0, 1, 1], [], []>} : vector<16x32xf32>, vector<32x32xf32>, vector<16x32xf32> -> vector<16x32xf32>
    %c0_87 = arith.constant 0 : index
    %c0_88 = arith.constant 0 : index
    %248 = vector.load %arg16[%c0_87, %c0_88] : memref<1x32xf32, #tpu.memory_space<vmem>>, vector<1x32xf32>
    %249 = vector.broadcast %248 : vector<1x32xf32> to vector<16x32xf32>
    %250 = arith.addf %247, %249 : vector<16x32xf32>
    %251 = arith.addf %250, %128 : vector<16x32xf32>
    %252 = vector.extract_strided_slice %0 {offsets = [2, 0], sizes = [1, 32], strides = [1, 1]} : vector<3x32xf32> to vector<1x32xf32>
    %253 = vector.shape_cast %252 : vector<1x32xf32> to vector<32xf32>
    %254 = vector.extract_strided_slice %1 {offsets = [2, 0], sizes = [1, 32], strides = [1, 1]} : vector<3x32xf32> to vector<1x32xf32>
    %255 = vector.shape_cast %254 : vector<1x32xf32> to vector<32xf32>
    %cst_89 = arith.constant dense<0.000000e+00> : vector<16xf32>
    %256 = vector.multi_reduction <add>, %251, %cst_89 [1] : vector<16x32xf32> to vector<16xf32>
    %257 = vector.shape_cast %256 : vector<16xf32> to vector<16x1xf32>
    %cst_90 = arith.constant 3.200000e+01 : f32
    %258 = vector.broadcast %cst_90 : f32 to vector<16x1xf32>
    %259 = arith.divf %257, %258 : vector<16x1xf32>
    %260 = vector.broadcast %259 : vector<16x1xf32> to vector<16x32xf32>
    %261 = arith.subf %251, %260 : vector<16x32xf32>
    %262 = arith.mulf %261, %261 : vector<16x32xf32>
    %cst_91 = arith.constant dense<0.000000e+00> : vector<16xf32>
    %263 = vector.multi_reduction <add>, %262, %cst_91 [1] : vector<16x32xf32> to vector<16xf32>
    %264 = vector.shape_cast %263 : vector<16xf32> to vector<16x1xf32>
    %cst_92 = arith.constant 3.200000e+01 : f32
    %265 = vector.broadcast %cst_92 : f32 to vector<16x1xf32>
    %266 = arith.divf %264, %265 : vector<16x1xf32>
    %267 = vector.broadcast %259 : vector<16x1xf32> to vector<16x32xf32>
    %268 = arith.subf %251, %267 : vector<16x32xf32>
    %cst_93 = arith.constant 9.99999997E-7 : f32
    %269 = vector.broadcast %cst_93 : f32 to vector<16x1xf32>
    %270 = arith.addf %266, %269 : vector<16x1xf32>
    %271 = math.rsqrt %270 : vector<16x1xf32>
    %272 = vector.broadcast %271 : vector<16x1xf32> to vector<16x32xf32>
    %273 = arith.mulf %268, %272 : vector<16x32xf32>
    %274 = vector.shape_cast %253 : vector<32xf32> to vector<1x32xf32>
    %275 = vector.broadcast %274 : vector<1x32xf32> to vector<16x32xf32>
    %276 = arith.mulf %275, %273 : vector<16x32xf32>
    %277 = vector.shape_cast %255 : vector<32xf32> to vector<1x32xf32>
    %278 = vector.broadcast %277 : vector<1x32xf32> to vector<16x32xf32>
    %279 = arith.addf %276, %278 : vector<16x32xf32>
    %c0_94 = arith.constant 0 : index
    %c0_95 = arith.constant 0 : index
    %280 = vector.load %arg17[%c0_94, %c0_95] : memref<32x64xf32, #tpu.memory_space<vmem>>, vector<32x64xf32>
    %cst_96 = arith.constant dense<0.000000e+00> : vector<16x64xf32>
    %281 = tpu.matmul %279, %280, %cst_96 {dimension_numbers = #tpu.dot_dimension_numbers<[1], [0], [0], [1], [0, 0, 1, 1], [], []>} : vector<16x32xf32>, vector<32x64xf32>, vector<16x64xf32> -> vector<16x64xf32>
    %c0_97 = arith.constant 0 : index
    %c0_98 = arith.constant 0 : index
    %282 = vector.load %arg18[%c0_97, %c0_98] : memref<1x64xf32, #tpu.memory_space<vmem>>, vector<1x64xf32>
    %283 = vector.broadcast %282 : vector<1x64xf32> to vector<16x64xf32>
    %284 = arith.addf %281, %283 : vector<16x64xf32>
    %cst_99 = arith.constant 0.000000e+00 : f32
    %285 = vector.broadcast %cst_99 : f32 to vector<16x64xf32>
    %286 = arith.maximumf %284, %285 : vector<16x64xf32>
    %c0_100 = arith.constant 0 : index
    %c0_101 = arith.constant 0 : index
    %287 = vector.load %arg19[%c0_100, %c0_101] : memref<64x32xf32, #tpu.memory_space<vmem>>, vector<64x32xf32>
    %cst_102 = arith.constant dense<0.000000e+00> : vector<16x32xf32>
    %288 = tpu.matmul %286, %287, %cst_102 {dimension_numbers = #tpu.dot_dimension_numbers<[1], [0], [0], [1], [0, 0, 1, 1], [], []>} : vector<16x64xf32>, vector<64x32xf32>, vector<16x32xf32> -> vector<16x32xf32>
    %c0_103 = arith.constant 0 : index
    %c0_104 = arith.constant 0 : index
    %289 = vector.load %arg20[%c0_103, %c0_104] : memref<1x32xf32, #tpu.memory_space<vmem>>, vector<1x32xf32>
    %290 = vector.broadcast %289 : vector<1x32xf32> to vector<16x32xf32>
    %291 = arith.addf %288, %290 : vector<16x32xf32>
    %292 = arith.addf %291, %251 : vector<16x32xf32>
    %293 = vector.shape_cast %292 : vector<16x32xf32> to vector<2x8x32xf32>
    %c0_105 = arith.constant 0 : index
    %c0_106 = arith.constant 0 : index
    %c0_107 = arith.constant 0 : index
    %294 = vector.load %arg21[%c0_105, %c0_106, %c0_107] : memref<2x8x32xf32, #tpu.memory_space<vmem>>, vector<2x8x32xf32>
    tpu.vector_store %arg21[%c0_105, %c0_106, %c0_107], %293 {strides = array<i32>} : memref<2x8x32xf32, #tpu.memory_space<vmem>>, vector<2x8x32xf32>,
    return
  }
  func.func @transform_0(%arg0: i32) -> (i32, i32, i32) {
    %c0_i32 = arith.constant 0 : i32
    %c0_i32_0 = arith.constant 0 : i32
    %c0_i32_1 = arith.constant 0 : i32
    return %arg0, %c0_i32, %c0_i32_0 : i32, i32, i32
  }
  func.func @transform_1(%arg0: i32) -> (i32, i32, i32) {
    %c0_i32 = arith.constant 0 : i32
    %c0_i32_0 = arith.constant 0 : i32
    %c0_i32_1 = arith.constant 0 : i32
    return %arg0, %c0_i32, %c0_i32_0 : i32, i32, i32
  }
  func.func @transform_2(%arg0: i32) -> (i32, i32, i32) {
    %c0_i32 = arith.constant 0 : i32
    %c0_i32_0 = arith.constant 0 : i32
    %c0_i32_1 = arith.constant 0 : i32
    return %arg0, %c0_i32, %c0_i32_0 : i32, i32, i32
  }
  func.func @transform_3(%arg0: i32) -> (i32, i32, i32) {
    %c0_i32 = arith.constant 0 : i32
    %c0_i32_0 = arith.constant 0 : i32
    %c0_i32_1 = arith.constant 0 : i32
    return %arg0, %c0_i32, %c0_i32_0 : i32, i32, i32
  }
  func.func @transform_4(%arg0: i32) -> (i32, i32) {
    %c0_i32 = arith.constant 0 : i32
    %c0_i32_0 = arith.constant 0 : i32
    %c0_i32_1 = arith.constant 0 : i32
    return %c0_i32, %c0_i32_0 : i32, i32
  }
  func.func @transform_5(%arg0: i32) -> (i32, i32) {
    %c0_i32 = arith.constant 0 : i32
    %c0_i32_0 = arith.constant 0 : i32
    %c0_i32_1 = arith.constant 0 : i32
    return %c0_i32, %c0_i32_0 : i32, i32
  }
  func.func @transform_6(%arg0: i32) -> (i32, i32) {
    %c0_i32 = arith.constant 0 : i32
    %c0_i32_0 = arith.constant 0 : i32
    %c0_i32_1 = arith.constant 0 : i32
    return %c0_i32, %c0_i32_0 : i32, i32
  }
  func.func @transform_7(%arg0: i32) -> (i32, i32) {
    %c0_i32 = arith.constant 0 : i32
    %c0_i32_0 = arith.constant 0 : i32
    %c0_i32_1 = arith.constant 0 : i32
    return %c0_i32, %c0_i32_0 : i32, i32
  }
  func.func @transform_8(%arg0: i32) -> (i32, i32) {
    %c0_i32 = arith.constant 0 : i32
    %c0_i32_0 = arith.constant 0 : i32
    %c0_i32_1 = arith.constant 0 : i32
    return %c0_i32, %c0_i32_0 : i32, i32
  }
  func.func @transform_9(%arg0: i32) -> (i32, i32) {
    %c0_i32 = arith.constant 0 : i32
    %c0_i32_0 = arith.constant 0 : i32
    %c0_i32_1 = arith.constant 0 : i32
    return %c0_i32, %c0_i32_0 : i32, i32
  }
  func.func @transform_10(%arg0: i32) -> (i32, i32) {
    %c0_i32 = arith.constant 0 : i32
    %c0_i32_0 = arith.constant 0 : i32
    %c0_i32_1 = arith.constant 0 : i32
    return %c0_i32, %c0_i32_0 : i32, i32
  }
  func.func @transform_11(%arg0: i32) -> (i32, i32) {
    %c0_i32 = arith.constant 0 : i32
    %c0_i32_0 = arith.constant 0 : i32
    %c0_i32_1 = arith.constant 0 : i32
    return %c0_i32, %c0_i32_0 : i32, i32
  }
  func.func @transform_12(%arg0: i32) -> (i32, i32) {
    %c0_i32 = arith.constant 0 : i32
    %c0_i32_0 = arith.constant 0 : i32
    %c0_i32_1 = arith.constant 0 : i32
    return %c0_i32, %c0_i32_0 : i32, i32
  }
  func.func @transform_13(%arg0: i32) -> (i32, i32) {
    %c0_i32 = arith.constant 0 : i32
    %c0_i32_0 = arith.constant 0 : i32
    %c0_i32_1 = arith.constant 0 : i32
    return %c0_i32, %c0_i32_0 : i32, i32
  }
  func.func @transform_14(%arg0: i32) -> (i32, i32) {
    %c0_i32 = arith.constant 0 : i32
    %c0_i32_0 = arith.constant 0 : i32
    %c0_i32_1 = arith.constant 0 : i32
    return %c0_i32, %c0_i32_0 : i32, i32
  }
  func.func @transform_15(%arg0: i32) -> (i32, i32) {
    %c0_i32 = arith.constant 0 : i32
    %c0_i32_0 = arith.constant 0 : i32
    %c0_i32_1 = arith.constant 0 : i32
    return %c0_i32, %c0_i32_0 : i32, i32
  }
  func.func @transform_16(%arg0: i32) -> (i32, i32) {
    %c0_i32 = arith.constant 0 : i32
    %c0_i32_0 = arith.constant 0 : i32
    %c0_i32_1 = arith.constant 0 : i32
    return %c0_i32, %c0_i32_0 : i32, i32
  }
  func.func @transform_17(%arg0: i32) -> (i32, i32) {
    %c0_i32 = arith.constant 0 : i32
    %c0_i32_0 = arith.constant 0 : i32
    %c0_i32_1 = arith.constant 0 : i32
    return %c0_i32, %c0_i32_0 : i32, i32
  }
  func.func @transform_18(%arg0: i32) -> (i32, i32) {
    %c0_i32 = arith.constant 0 : i32
    %c0_i32_0 = arith.constant 0 : i32
    %c0_i32_1 = arith.constant 0 : i32
    return %c0_i32, %c0_i32_0 : i32, i32
  }
  func.func @transform_19(%arg0: i32) -> (i32, i32) {
    %c0_i32 = arith.constant 0 : i32
    %c0_i32_0 = arith.constant 0 : i32
    %c0_i32_1 = arith.constant 0 : i32
    return %c0_i32, %c0_i32_0 : i32, i32
  }
  func.func @transform_20(%arg0: i32) -> (i32, i32, i32) {
    %c0_i32 = arith.constant 0 : i32
    %c0_i32_0 = arith.constant 0 : i32
    %c0_i32_1 = arith.constant 0 : i32
    return %arg0, %c0_i32, %c0_i32_0 : i32, i32, i32
  }
}

</mosaic_0001>

<bundles_post_ra>
// kernel: tpu_custom_call.1
= control target key start
LH: loop header
LB: loop body
LE: loop exit
PB: predicated region body
PF: predicated region fallthrough
CT: control target
= control target key end

     0   :  { %s2768_s0 = inlined_call_operand.hbm [shape: f32[2,8,32], index: 0, kind: input, shape index: {}]   ;;  %s2769_s1 = inlined_call_operand.hbm [shape: f32[2,8,32], index: 1, kind: input, shape index: {}]   ;;  %s2770_s2 = inlined_call_operand.hbm [shape: f32[2,8,8], index: 2, kind: input, shape index: {}]   ;;  %s2771_s3 = inlined_call_operand.hbm [shape: f32[2,1,8], index: 3, kind: input, shape index: {}]   ;;  %s2772_s4 = inlined_call_operand.hbm [shape: f32[3,32], index: 4, kind: input, shape index: {}]   ;;  %s2773_s5 = inlined_call_operand.hbm [shape: f32[3,32], index: 5, kind: input, shape index: {}]   ;;  %s2774_s6 = inlined_call_operand.vmem [shape: f32[32,96], index: 6, kind: input, shape index: {}]   ;;  %s2775_s7 = inlined_call_operand.vmem [shape: f32[1,96], index: 7, kind: input, shape index: {}]   ;;  %s2776_s8 = inlined_call_operand.vmem [shape: f32[32,32], index: 8, kind: input, shape index: {}]   ;;  %s2777_s9 = inlined_call_operand.vmem [shape: f32[1,32], index: 9, kind: input, shape index: {}]   ;;  %s2778_s10 = inlined_call_operand.vmem [shape: f32[32,64], index: 10, kind: input, shape index: {}]   ;;  %s2779_s11 = inlined_call_operand.vmem [shape: f32[1,64], index: 11, kind: input, shape index: {}]   ;;  %s2780_s12 = inlined_call_operand.hbm [shape: f32[32,32], index: 12, kind: input, shape index: {}]   ;;  %s2781_s13 = inlined_call_operand.vmem [shape: f32[1,32], index: 13, kind: input, shape index: {}]   ;;  %s2782_s14 = inlined_call_operand.hbm [shape: f32[32,32], index: 14, kind: input, shape index: {}]   ;;  %s2783_s15 = inlined_call_operand.vmem [shape: f32[1,32], index: 15, kind: input, shape index: {}]   ;;  %s2784_s16 = inlined_call_operand.hbm [shape: f32[32,64], index: 16, kind: input, shape index: {}]   ;;  %s2785_s17 = inlined_call_operand.vmem [shape: f32[1,64], index: 17, kind: input, shape index: {}]   ;;  %s2786_s18 = inlined_call_operand.vmem [shape: f32[64,32], index: 18, kind: input, shape index: {}]   ;;  %s2787_s19 = inlined_call_operand.vmem [shape: f32[1,32], index: 19, kind: input, shape index: {}]   ;;  %s2788_s20 = inlined_call_operand.hbm [shape: f32[2,8,32], index: 20, kind: output, shape index: {}]  }
   0x1   :  { %2793 = sst [smem:[#allocation24_spill]] %s2768_s0 }
   0x2   :  { %2794 = sst [smem:[#allocation25_spill]] %s2769_s1 }
   0x3   :  { %2795 = sst [smem:[#allocation26_spill]] %s2770_s2 }
   0x4   :  { %2796 = sst [smem:[#allocation27_spill]] %s2771_s3 }
   0x5   :  { %2797 = sst [smem:[#allocation28_spill]] %s2772_s4 }
   0x6   :  { %2798 = sst [smem:[#allocation29_spill]] %s2787_s19 }
   0x7   :  { %2799 = sst [smem:[#allocation30_spill]] %s2788_s20 }
   0x8   :  { %25 = vsyncpa [#allocation3], 0 }
   0x9   :  { %26 = vsyncpa [#allocation6], 0 }
   0xa   :  { %27 = vsyncpa [#allocation9], 0 }
   0xb   :  { %28 = vsyncpa [#allocation12], 0 }
   0xc   :  { %29 = vsyncpa [#allocation15], 0 }
   0xd   :  { %30 = vsyncpa [#allocation4], 0  ;;  %s2800_s23 = sld [smem:[#allocation25_spill]]  ;;  %s2228_s2 = smov [#allocation5]  }
   0xe   :  { %s50_s25 = sshll.u32 %s2228_s2, 4  ;;  %s2801_s27 = sld [smem:[#allocation27_spill]]  ;;  %s51_s25 = int_to_ptr.vmem [resolvable:$true] %s50_s25 }
   0xf   :  { %s2789_s4 = smov 128   ;;  %s2791_s29 = smov 8  }
  0x10   :  { %s2231_s30 = smov [#allocation8]   ;;  %s2232_s21 = smov 16  }
  0x11   :  { %s76_s0 = sshll.u32 %s2231_s30, 4  ;;  %s2233_s1 = smov 1   ;;  %s77_s0 = int_to_ptr.vmem [resolvable:$true] %s76_s0 }
  0x12   :  { %s99_s2 = sshll.u32 %s2773_s5, 4  ;;  %s2234_s3 = smov [#allocation11]   ;;  %s100_s2 = int_to_ptr.hbm [resolvable:$true] %s99_s2 }
  0x13   :  { %s48_s24 = sshll.u32 %s2800_s23, 4  ;;  %s101_s26 = sshll.u32 %s2234_s3, 4  ;;  %s49_s24 = int_to_ptr.hbm [resolvable:$true] %s48_s24  ;;  %s102_s26 = int_to_ptr.vmem [resolvable:$true] %s101_s26 }
  0x14   :  { %s74_s28 = sshll.u32 %s2801_s27, 4  ;;  %s2802_s19 = sld [smem:[#allocation24_spill]]  ;;  %s75_s28 = int_to_ptr.hbm [resolvable:$true] %s74_s28 }
  0x15   :  { %56 = dma.hbm_to_vmem [thread:$0]  %s49_s24, 256, %s51_s25, [#allocation6], %s2789_s4, %s2789_s4, %s2791_s29  }
  0x16   :  { %82 = dma.hbm_to_vmem [thread:$0]  %s75_s28, 32, %s77_s0, [#allocation9], %s2232_s21, %s2232_s21, %s2233_s1  }
  0x17   :  { %s136_s24 = sshll.u32 %s2782_s14, 4  ;;  %s2235_s25 = smov [#allocation14]   ;;  %s137_s24 = int_to_ptr.hbm [resolvable:$true] %s136_s24 }
  0x18   :  { %104 = dma.hbm_to_vmem [thread:$0]  %s100_s2, 64, %s102_s26, [#allocation12]  }
  0x19   :  { %s138_s30 = sshll.u32 %s2235_s25, 4  ;;  %s2803_s0 = smov 8   ;;  %s139_s30 = int_to_ptr.vmem [resolvable:$true] %s138_s30 }
  0x1a   :  { %s35_s28 = sshll.u32 %s2802_s19, 4  ;;  %s2804_s5 = smov 128   ;;  %s36_s28 = int_to_ptr.hbm [resolvable:$true] %s35_s28 }
  0x1b   :  { %144 = dma.hbm_to_vmem [thread:$0]  %s137_s24, 512, %s139_s30, [#allocation15], %s2804_s5, %s2804_s5, %s2803_s0  }
  0x1c   :  { %s2805_s23 = sld [smem:[#allocation26_spill]]  ;;  %s2236_s20 = smov [#allocation2]  }
  0x1d   :  { %s37_s14 = sshll.u32 %s2236_s20, 4  ;;  %s2237_s4 = smov [#allocation7]   ;;  %s38_s14 = int_to_ptr.vmem [resolvable:$true] %s37_s14 }
  0x1e   :  { %43 = dma.hbm_to_vmem [thread:$0]  %s36_s28, 256, %s38_s14, [#allocation3], %s2804_s5, %s2804_s5, %s2803_s0  }
  0x1f   :  { %s63_s19 = sshll.u32 %s2237_s4, 4  ;;  %s2806_s26 = sld [smem:[#allocation28_spill]]  ;;  %s64_s19 = int_to_ptr.vmem [resolvable:$true] %s63_s19 }
  0x20   :  { %s121_s30 = sshll.u32 %s2780_s12, 4  ;;  %s2238_s1 = smov [#allocation10]   ;;  %s122_s30 = int_to_ptr.hbm [resolvable:$true] %s121_s30 }
  0x21   :  { %s90_s22 = sshll.u32 %s2238_s1, 4  ;;  %s2239_s28 = smov [#allocation13]   ;;  %s91_s22 = int_to_ptr.vmem [resolvable:$true] %s90_s22 }
  0x22   :  { %s61_s3 = sshll.u32 %s2805_s23, 4  ;;  %s123_s23 = sshll.u32 %s2239_s28, 4  ;;  %s62_s3 = int_to_ptr.hbm [resolvable:$true] %s61_s3  ;;  %s124_s23 = int_to_ptr.vmem [resolvable:$true] %s123_s23 }
  0x23   :  { %69 = dma.hbm_to_vmem [thread:$0]  %s62_s3, 256, %s64_s19, [#allocation6], %s2804_s5, %s2804_s5, %s2803_s0  }
  0x24   :  { %s151_s4 = sshll.u32 %s2784_s16, 4  ;;  %s2240_s3 = smov [#allocation16]   ;;  %s152_s4 = int_to_ptr.hbm [resolvable:$true] %s151_s4 }
  0x25   :  { %s88_s27 = sshll.u32 %s2806_s26, 4  ;;  %s153_s19 = sshll.u32 %s2240_s3, 4  ;;  %s89_s27 = int_to_ptr.hbm [resolvable:$true] %s88_s27  ;;  %s154_s19 = int_to_ptr.vmem [resolvable:$true] %s153_s19 }
  0x26   :  { %93 = dma.hbm_to_vmem [thread:$0]  %s89_s27, 64, %s91_s22, [#allocation9]  }
  0x27   :  { %129 = dma.hbm_to_vmem [thread:$0]  %s122_s30, 512, %s124_s23, [#allocation12], %s2804_s5, %s2804_s5, %s2803_s0  }
  0x28   :  { %159 = dma.hbm_to_vmem [thread:$0]  %s152_s4, 512, %s154_s19, [#allocation15], %s2804_s5, %s2804_s5, %s2803_s0  }
  0x29   :  { %2216 = dma.done.wait [#allocation3], 256  }
  0x2a   :  { %2217 = vsyncadd [#allocation3], 4294967040 }
  0x2b   :  { %2218 = dma.done.wait [#allocation6], 512  }
  0x2c   :  { %2219 = vsyncadd [#allocation6], 4294966784 }
  0x2d   :  { %2220 = dma.done.wait [#allocation9], 96  }
  0x2e   :  { %2221 = vsyncadd [#allocation9], 4294967200 }
  0x2f   :  { %2222 = dma.done.wait [#allocation12], 576  }
  0x30   :  { %2223 = vsyncadd [#allocation12], 4294966720 }
  0x31   :  { %2224 = dma.done.wait [#allocation15], 1024  }
  0x32   :  { %2225 = vsyncadd [#allocation15], 4294966272  ;;  %vm218_vm0 = vcmask 261120   ;;  %v2408_v0 = vld [vmem:[#allocation2] sm:$0xff]  ;;  %v2412_v2 = vld [vmem:[#allocation2 + $0x8] sm:$0xff]  ;;  %v2241_v4 = vmov 32.0  }
  0x33   :  { %v219_v1 = vsel %vm218_vm0, %v2408_v0, 0.0  ;;  %v222_v3 = vsel %vm218_vm0, %v2412_v2, 0.0  ;;  %1896 = vrcp.f32 %v2241_v4  ;;  %v279_v21 = vld [vmem:[%s2774_s6 + $0x18] sm:$0xff]  ;;  %v278_v22 = vld [vmem:[%s2774_s6 + $0x10] sm:$0xff]  ;;  %v277_v23 = vld [vmem:[%s2774_s6 + $0x8] sm:$0xff]  ;;  %vm318_vm8 = vcmask 64512  }
  0x34   :  { %220 = vadd.xlane.f32.xlu0 %v219_v1  ;;  %302 = vmatpush.msra.mxu0 %v279_v21  ;;  %v276_v24 = vld [vmem:[%s2774_s6] sm:$0xff]  ;;  %v2438_v36 = vld [vmem:[#allocation10] sm:$0x7]  ;;  %v2440_v40 = vld [vmem:[#allocation11] sm:$0x7]  ;;  %s2242_s1 = smov 64  }
  0x35   :  { %v270_v41 = vperm.slane %v2438_v36, 0  ;;  %v273_v45 = vperm.slane %v2440_v40, 0  ;;  %v1889_v55 = vld [vmem:[%s2775_s7] ss:$0 sm:$0xff]  ;;  %s2243_s7 = smov 56   ;;  %s2244_s22 = smov 120  }
  0x36   :  { %303 = vmatpush.msra.mxu0 %v278_v22  ;;  %s2245_s28 = smov 40   ;;  %s2246_s23 = smov 48   ;;  %vm862_vm11 = vcmask 130048   ;;  %vm865_vm12 = vcmask 195584  }
  0x37   :  { %s2247_s20 = smov 104   ;;  %s2248_s14 = smov 112  }
  0x38   :  { %304 = vmatpush.msra.mxu0 %v277_v23  ;;  %s2249_s4 = smov 96   ;;  %s2251_s3 = smov 80  }
  0x39   :  { %v1897_v5 = vpop.eup %1896  ;;  %s2252_s19 = smov 88   ;;  %s2253_s12 = smov 72  }
  0x3a   :  { %v226_v6 = vmul.f32 32.0, %v1897_v5  ;;  %vm230_vm1 = vweird.f32 %v1897_v5  ;;  %305 = vmatpush.msra.mxu0 %v276_v24  ;;  %s2254_s16 = smov 24   ;;  %s2807_s27 = sld [smem:[#allocation29_spill]] }
  0x3c   :  { %223 = vadd.xlane.f32.xlu0 %v222_v3  ;;  %v227_v7 = vsub.f32 1.0, %v226_v6 }
  0x3e   :  { %v228_v8 = vmul.f32 %v1897_v5, %v227_v7 }
  0x40   :  { %v229_v9 = vadd.f32 %v1897_v5, %v228_v8 }
  0x42   :  { %v2416_v10 = vsel %vm230_vm1, %v1897_v5, %v229_v9 }
  0xa7   :  { %v221_v11 = vpop.xlane.xlu0 %220 }
  0xa8   :  { %v232_v12 = vmul.f32 %v2416_v10, %v221_v11 }
  0xaa   :  { %v234_v13 = vsub.f32 %v2408_v0, %v232_v12 }
  0xac   :  { %v236_v14 = vmul.f32 %v234_v13, %v234_v13 }
  0xae   :  { %v238_v15 = vsel %vm218_vm0, %v236_v14, 0.0 }
  0xaf   :  { %239 = vadd.xlane.f32.xlu1 %v238_v15  ;;  %v224_v16 = vpop.xlane.xlu0 %223 }
  0xb0   :  { %v233_v17 = vmul.f32 %v2416_v10, %v224_v16 }
  0xb2   :  { %v235_v18 = vsub.f32 %v2412_v2, %v233_v17 }
  0xb4   :  { %v237_v19 = vmul.f32 %v235_v18, %v235_v18 }
  0xb6   :  { %v241_v20 = vsel %vm218_vm0, %v237_v19, 0.0  ;;  %v204_v19 = vld [vmem:[#allocation7] sm:$0xff] }
  0xb7   :  { %242 = vadd.xlane.f32.xlu1 %v241_v20  ;;  %vm206_vm9 = vcmp.gt.f32.partialorder %v204_v19, 0.0  ;;  %v2250_v20 = vmov -1e+30  }
  0xb8   :  { %v208_v21 = vsel %vm206_vm9, 0.0, %v2250_v20 }
 0x122   :  { %v240_v25 = vpop.xlane.xlu1 %239 }
 0x123   :  { %v244_v26 = vmul.f32 %v240_v25, %v2416_v10  ;;  %v205_v25 = vld [vmem:[#allocation7 + $0x8] sm:$0xff] }
 0x124   :  { %vm207_vm10 = vcmp.gt.f32.partialorder %v205_v25, 0.0 }
 0x125   :  { %v246_v27 = vadd.f32 1e-06, %v244_v26  ;;  %v209_v26 = vsel %vm207_vm10, 0.0, %v2250_v20 }
 0x127   :  { %1898 = vrsqrt.f32 %v246_v27  ;;  %vm254_vm3 = vweird.f32 %v246_v27 }
 0x12a   :  { %v243_v28 = vpop.xlane.xlu1 %242 }
 0x12b   :  { %v245_v29 = vmul.f32 %v243_v28, %v2416_v10 }
 0x12d   :  { %v1899_v30 = vpop.eup %1898  ;;  %v247_v31 = vadd.f32 1e-06, %v245_v29 }
 0x12e   :  { %v249_v32 = vmul.f32 %v1899_v30, %v246_v27  ;;  %vm255_vm2 = vweird.f32 %v1899_v30 }
 0x12f   :  { %1900 = vrsqrt.f32 %v247_v31  ;;  %vm256_vm4 = vmor %vm254_vm3, %vm255_vm2  ;;  %vm264_vm5 = vweird.f32 %v247_v31 }
 0x130   :  { %v250_v33 = vmul.f32 %v1899_v30, %v249_v32 }
 0x132   :  { %v251_v34 = vmul.f32 0.5, %v250_v33 }
 0x134   :  { %v252_v35 = vsub.f32 1.5, %v251_v34 }
 0x135   :  { %v1901_v37 = vpop.eup %1900 }
 0x136   :  { %v253_v38 = vmul.f32 %v1899_v30, %v252_v35  ;;  %v259_v39 = vmul.f32 %v1901_v37, %v247_v31  ;;  %vm265_vm6 = vweird.f32 %v1901_v37 }
 0x137   :  { %vm266_vm7 = vmor %vm264_vm5, %vm265_vm6 }
 0x138   :  { %v257_v42 = vsel %vm256_vm4, %v1899_v30, %v253_v38  ;;  %v260_v43 = vmul.f32 %v1901_v37, %v259_v39 }
 0x139   :  { %v268_v44 = vmul.f32 %v257_v42, %v234_v13 }
 0x13a   :  { %v261_v46 = vmul.f32 0.5, %v260_v43 }
 0x13b   :  { %v271_v47 = vmul.f32 %v270_v41, %v268_v44 }
 0x13c   :  { %v262_v48 = vsub.f32 1.5, %v261_v46 }
 0x13d   :  { %v274_v49 = vadd.f32 %v273_v45, %v271_v47 }
 0x13e   :  { %v263_v50 = vmul.f32 %v1901_v37, %v262_v48 }
 0x13f   :  { %1784 = vmatmul.msk.f32.vlgmr.msra.gmra.mxu0 %vm218_vm0, %v274_v49 }
 0x140   :  { %v267_v51 = vsel %vm266_vm7, %v1901_v37, %v263_v50 }
 0x141   :  { %v269_v52 = vmul.f32 %v267_v51, %v235_v18 }
 0x143   :  { %v272_v53 = vmul.f32 %v270_v41, %v269_v52 }
 0x145   :  { %v275_v54 = vadd.f32 %v273_v45, %v272_v53 }
 0x147   :  { %1785 = vmatmul.msk.f32.gmra.mxu0 %vm218_vm0, %v275_v54 }
 0x1bc   :  { %v307_v56 = vpop.f32.mrf.mxu0 }
 0x1bd   :  { %v2449_v57 = vadd.f32 %v1889_v55, %v307_v56 }
 0x1bf   :  { %1786 = vmatpush.xpose.msk.msra.mxu1 %vm318_vm8, %v2449_v57  ;;  %v313_v58 = vmul.f32 0.35355338, %v2449_v57 }
 0x1c1   :  { %316 = vrot.lane.b32.xlu2 %v313_v58, %s2242_s1 }
 0x1c4   :  { %v310_v59 = vpop.f32.mrf.mxu0 }
 0x1c5   :  { %v2454_v60 = vadd.f32 %v1889_v55, %v310_v59 }
 0x1c7   :  { %1788 = vmatpush.xpose.msk.msrb.mxu0 %vm318_vm8, %v2454_v60  ;;  %v314_v61 = vmul.f32 0.35355338, %v2454_v60  ;;  %v1874_v62 = vpack.i.bf16 %v2454_v60, %v2449_v57 }
 0x1c9   :  { %474 = vrot.lane.b32.xlu1 %v314_v61, %s2243_s7  ;;  %345 = vrot.lane.b32.xlu0 %v314_v61, %s2242_s1 }
 0x1ca   :  { %476 = vrot.lane.b32.xlu2 %v2454_v60, %s2244_s22 }
 0x1d1   :  { %706 = vrot.lane.b32.xlu1 %v313_v58, %s2245_s28  ;;  %576 = vrot.lane.b32.xlu0 %v313_v58, %s2246_s23 }
 0x1d2   :  { %448 = vrot.lane.b32.xlu2 %v2449_v57, %s2244_s22 }
 0x1d9   :  { %736 = vrot.lane.b32.xlu1 %v2454_v60, %s2247_s20  ;;  %606 = vrot.lane.b32.xlu0 %v2454_v60, %s2248_s14 }
 0x1da   :  { %578 = vrot.lane.b32.xlu2 %v2449_v57, %s2248_s14 }
 0x1e1   :  { %1875 = vrot.lane.b32.xlu1 %v1874_v62, %s2249_s4  ;;  %734 = vrot.lane.b32.xlu0 %v314_v61, %s2245_s28 }
 0x1e2   :  { %446 = vrot.lane.b32.xlu2 %v313_v58, %s2243_s7 }
 0x1ea   :  { %708 = vrot.lane.b32.xlu2 %v2449_v57, %s2247_s20 }
 0x1f2   :  { %604 = vrot.lane.b32.xlu2 %v314_v61, %s2246_s23 }
 0x21b   :  { %v317_v63 = vpop.permute.xlu2 %316 }
 0x21c   :  { %1787 = vmatmul.msk.f32.vlgmr.msra.gmra.mxu1 %vm318_vm8, %v317_v63 }
 0x224   :  { %v477_v1 = vpop.permute.xlu2 %476 }
 0x225   :  { %1794 = vmatpush.xpose.msk.msra.mxu2 %vm318_vm8, %v477_v1 }
 0x22c   :  { %v449_v3 = vpop.permute.xlu2 %448 }
 0x22d   :  { %1792 = vmatpush.xpose.msk.msrb.mxu1 %vm318_vm8, %v449_v3 }
 0x234   :  { %v579_v4 = vpop.permute.xlu2 %578 }
 0x235   :  { %1798 = vmatpush.xpose.msk.msrb.mxu2 %vm318_vm8, %v579_v4 }
 0x23b   :  { %v475_v5 = vpop.permute.xlu1 %474  ;;  %v346_v6 = vpop.permute.xlu0 %345 }
 0x23c   :  { %v447_v7 = vpop.permute.xlu2 %446  ;;  %1789 = vmatmul.msk.f32.vlgmr.msrb.gmra.mxu0 %vm318_vm8, %v346_v6  ;;  %1795 = vmatmul.msk.f32.vlgmr.msra.gmra.mxu2 %vm318_vm8, %v475_v5 }
 0x23d   :  { %1793 = vmatmul.msk.f32.vlgmr.msrb.gmra.mxu1 %vm318_vm8, %v447_v7 }
 0x243   :  { %v707_v8 = vpop.permute.xlu1 %706  ;;  %v577_v9 = vpop.permute.xlu0 %576 }
 0x244   :  { %v709_v11 = vpop.permute.xlu2 %708  ;;  %1799 = vmatmul.msk.f32.vlgmr.msrb.gmra.mxu2 %vm318_vm8, %v577_v9 }
 0x245   :  { %1804 = vmatpush.xpose.msk.msra.mxu2 %vm318_vm8, %v709_v11 }
 0x24b   :  { %v737_v12 = vpop.permute.xlu1 %736  ;;  %v607_v13 = vpop.permute.xlu0 %606 }
 0x24c   :  { %1800 = vmatpush.xpose.msk.msra.mxu0 %vm318_vm8, %v607_v13  ;;  %1805 = vmatmul.msk.f32.vlgmr.msra.gmra.mxu2 %vm318_vm8, %v707_v8  ;;  %v605_v14 = vpop.permute.xlu2 %604 }
 0x24f   :  { %1801 = vmatmul.msk.f32.vlgmr.msra.gmra.mxu0 %vm318_vm8, %v605_v14 }
 0x250   :  { %1806 = vmatpush.xpose.msk.msrb.mxu0 %vm318_vm8, %v737_v12 }
 0x253   :  { %v1876_v15 = vpop.permute.xlu1 %1875  ;;  %v735_v18 = vpop.permute.xlu0 %734 }
 0x254   :  { %v1877_v16 = vunpack.i.l.bf16 %v1876_v15  ;;  %v1878_v17 = vunpack.i.h.bf16 %v1876_v15 }
 0x256   :  { %415 = vmatpush.msra.mxu3 %v1877_v16 }
 0x257   :  { %1807 = vmatmul.msk.f32.vlgmr.msrb.gmra.mxu0 %vm318_vm8, %v735_v18 }
 0x258   :  { %441 = vmatpush.msrb.mxu3 %v1878_v17 }
 0x299   :  { %v341_v22 = vpop.f32.mrf.mxu1 }
 0x29a   :  { %v342_v23 = vadd.f32 %v341_v22, %v208_v21 }
 0x29c   :  { %v372_v24 = vsel %vm318_vm8, %v342_v23, -inf }
 0x29d   :  { %373 = vmax.xlane.f32.xlu2 %v372_v24 }
 0x2b5   :  { %654 = vrot.lane.b32.xlu2 %v2449_v57, %s2251_s3 }
 0x2b9   :  { %v369_v27 = vpop.f32.mrf.mxu0 }
 0x2ba   :  { %v370_v28 = vadd.f32 %v369_v27, %v209_v26  ;;  %v471_v29 = vpop.f32.mrf.mxu1 }
 0x2bb   :  { %v472_v30 = vadd.f32 %v471_v29, %v208_v21 }
 0x2bc   :  { %v375_v31 = vsel %vm318_vm8, %v370_v28, -inf }
 0x2bd   :  { %376 = vmax.xlane.f32.xlu1 %v375_v31  ;;  %v502_v32 = vsel %vm318_vm8, %v472_v30, -inf }
 0x2be   :  { %503 = vmax.xlane.f32.xlu0 %v502_v32 }
 0x2bf   :  { %v499_v33 = vpop.f32.mrf.mxu2 }
 0x2c0   :  { %v500_v34 = vadd.f32 %v499_v33, %v209_v26 }
 0x2c2   :  { %v505_v35 = vsel %vm318_vm8, %v500_v34, -inf }
 0x2c6   :  { %506 = vmax.xlane.f32.xlu0 %v505_v35 }
 0x2c7   :  { %v601_v37 = vpop.f32.mrf.mxu2 }
 0x2c8   :  { %v602_v45 = vadd.f32 %v601_v37, %v208_v21 }
 0x2ca   :  { %v632_v46 = vsel %vm318_vm8, %v602_v45, -inf }
 0x2cc   :  { %v629_v42 = vpop.f32.mrf.mxu0 }
 0x2cd   :  { %v630_v43 = vadd.f32 %v629_v42, %v209_v26 }
 0x2cf   :  { %v731_v38 = vpop.f32.mrf.mxu2  ;;  %v635_v44 = vsel %vm318_vm8, %v630_v43, -inf }
 0x2d0   :  { %v732_v39 = vadd.f32 %v731_v38, %v208_v21 }
 0x2d2   :  { %v762_v41 = vsel %vm318_vm8, %v732_v39, -inf }
 0x2d3   :  { %763 = vmax.xlane.f32.xlu1 %v762_v41 }
 0x2d4   :  { %v759_v47 = vpop.f32.mrf.mxu0 }
 0x2d5   :  { %v2501_v48 = vadd.f32 %v759_v47, %v209_v26 }
 0x2d7   :  { %v765_v49 = vsel %vm318_vm8, %v2501_v48, -inf }
 0x2da   :  { %524 = vrot.lane.b32.xlu0 %v2449_v57, %s2252_s19 }
 0x2de   :  { %636 = vmax.xlane.f32.xlu2 %v635_v44 }
 0x2e6   :  { %633 = vmax.xlane.f32.xlu2 %v632_v46 }
 0x304   :  { %766 = vmax.xlane.f32.xlu0 %v765_v49 }
 0x310   :  { %v374_v50 = vpop.xlane.xlu2 %373 }
 0x311   :  { %v378_v51 = vsub.f32 %v342_v23, %v374_v50 }
 0x313   :  { %v380_v52 = vmul.f32 1.442695, %v378_v51 }
 0x315   :  { %1902 = vpow2.f32 %v380_v52 }
 0x318   :  { %v655_v11 = vpop.permute.xlu2 %654 }
 0x31b   :  { %v1903_v53 = vpop.eup %1902 }
 0x31c   :  { %v384_v54 = vsel %vm318_vm8, %v1903_v53, 0.0 }
 0x31d   :  { %385 = vadd.xlane.f32.xlu1 %v384_v54 }
 0x330   :  { %v377_v55 = vpop.xlane.xlu1 %376 }
 0x331   :  { %v379_v56 = vsub.f32 %v370_v28, %v377_v55  ;;  %v504_v58 = vpop.xlane.xlu0 %503 }
 0x332   :  { %v508_v59 = vsub.f32 %v472_v30, %v504_v58 }
 0x333   :  { %v382_v61 = vmul.f32 1.442695, %v379_v56 }
 0x334   :  { %v510_v62 = vmul.f32 1.442695, %v508_v59 }
 0x335   :  { %1904 = vpow2.f32 %v382_v61 }
 0x336   :  { %1906 = vpow2.f32 %v510_v62  ;;  %784 = vrot.lane.b32.xlu1 %v2449_v57, %s2253_s12 }
 0x339   :  { %v507_v63 = vpop.xlane.xlu0 %506 }
 0x33a   :  { %v509_v1 = vsub.f32 %v500_v34, %v507_v63 }
 0x33b   :  { %v1905_v3 = vpop.eup %1904 }
 0x33c   :  { %v1907_v4 = vpop.eup %1906  ;;  %v512_v5 = vmul.f32 1.442695, %v509_v1  ;;  %v387_v6 = vsel %vm318_vm8, %v1905_v3, 0.0 }
 0x33d   :  { %v514_v7 = vsel %vm318_vm8, %v1907_v4, 0.0  ;;  %388 = vadd.xlane.f32.xlu2 %v387_v6 }
 0x33e   :  { %1908 = vpow2.f32 %v512_v5  ;;  %515 = vadd.xlane.f32.xlu0 %v514_v7 }
 0x344   :  { %v2510_v8 = vpop.eup %1908 }
 0x345   :  { %v517_v9 = vsel %vm318_vm8, %v2510_v8, 0.0 }
 0x346   :  { %518 = vadd.xlane.f32.xlu0 %v517_v9  ;;  %v764_v14 = vpop.xlane.xlu1 %763 }
 0x347   :  { %v768_v18 = vsub.f32 %v732_v39, %v764_v14 }
 0x349   :  { %v770_v22 = vmul.f32 1.442695, %v768_v18 }
 0x34c   :  { %v525_v28 = vpop.permute.xlu0 %524 }
 0x351   :  { %v637_v57 = vpop.xlane.xlu2 %636 }
 0x352   :  { %v639_v12 = vsub.f32 %v630_v43, %v637_v57  ;;  %v870_v57 = vld [vmem:[%s2776_s8 + $0x10] sm:$0xff] }
 0x354   :  { %v642_v13 = vmul.f32 1.442695, %v639_v12  ;;  %v869_v12 = vld [vmem:[%s2776_s8 + $0x8] sm:$0xff] }
 0x356   :  { %1910 = vpow2.f32 %v642_v13  ;;  %v868_v13 = vld [vmem:[%s2776_s8] sm:$0xff] }
 0x359   :  { %v634_v15 = vpop.xlane.xlu2 %633 }
 0x35a   :  { %680 = vrot.lane.b32.xlu0 %v2454_v60, %s2251_s3  ;;  %v638_v16 = vsub.f32 %v602_v45, %v634_v15 }
 0x35c   :  { %v2516_v17 = vpop.eup %1910  ;;  %v640_v19 = vmul.f32 1.442695, %v638_v16 }
 0x35d   :  { %v647_v21 = vsel %vm318_vm8, %v2516_v17, 0.0 }
 0x35e   :  { %1912 = vpow2.f32 %v640_v19 }
 0x35f   :  { %1914 = vpow2.f32 %v770_v22 }
 0x360   :  { %648 = vadd.xlane.f32.xlu1 %v647_v21 }
 0x364   :  { %v1913_v23 = vpop.eup %1912 }
 0x365   :  { %v644_v24 = vsel %vm318_vm8, %v1913_v23, 0.0  ;;  %v1915_v25 = vpop.eup %1914 }
 0x366   :  { %645 = vadd.xlane.f32.xlu2 %v644_v24  ;;  %v774_v26 = vsel %vm318_vm8, %v1915_v25, 0.0 }
 0x36e   :  { %775 = vadd.xlane.f32.xlu2 %v774_v26 }
 0x377   :  { %v767_v31 = vpop.xlane.xlu0 %766 }
 0x378   :  { %v769_v32 = vsub.f32 %v2501_v48, %v767_v31 }
 0x379   :  { %810 = vrot.lane.b32.xlu1 %v2454_v60, %s2253_s12 }
 0x37a   :  { %v772_v33 = vmul.f32 1.442695, %v769_v32 }
 0x386   :  { %550 = vrot.lane.b32.xlu2 %v2454_v60, %s2252_s19 }
 0x390   :  { %v386_v27 = vpop.xlane.xlu1 %385 }
 0x391   :  { %1916 = vrcp.f32 %v386_v27  ;;  %v1890_v27 = vld [vmem:[%s2777_s9] ss:$0 sm:$0xff] }
 0x392   :  { %1918 = vpow2.f32 %v772_v33 }
 0x397   :  { %v1917_v29 = vpop.eup %1916 }
 0x398   :  { %v392_v30 = vmul.f32 %v1917_v29, %v1903_v53  ;;  %v1919_v34 = vpop.eup %1918 }
 0x399   :  { %v777_v35 = vsel %vm318_vm8, %v1919_v34, 0.0 }
 0x39a   :  { %1790 = vmatmul.msk.f32.vlgmr.msra.gmra.mxu3 %vm318_vm8, %v392_v30 }
 0x39b   :  { %545 = vmatpush.msra.mxu3 %v525_v28 }
 0x3a8   :  { %v785_v43 = vpop.permute.xlu1 %784 }
 0x3af   :  { %778 = vadd.xlane.f32.xlu2 %v777_v35 }
 0x3b0   :  { %v389_v37 = vpop.xlane.xlu2 %388 }
 0x3b1   :  { %1920 = vrcp.f32 %v389_v37  ;;  %v516_v60 = vpop.xlane.xlu0 %515 }
 0x3b2   :  { %1922 = vrcp.f32 %v516_v60 }
 0x3b7   :  { %v1921_v38 = vpop.eup %1920 }
 0x3b8   :  { %v393_v39 = vmul.f32 %v1921_v38, %v1905_v3  ;;  %v1923_v41 = vpop.eup %1922 }
 0x3b9   :  { %v522_v42 = vmul.f32 %v1923_v41, %v1907_v4  ;;  %v519_v45 = vpop.xlane.xlu0 %518  ;;  %v962_v41 = vld [vmem:[%s2778_s10 + $0x18] sm:$0xff] }
 0x3ba   :  { %1791 = vmatmul.msk.f32.vlgmr.msrb.gmra.mxu3 %vm318_vm8, %v393_v39  ;;  %985 = vmatpush.msra.mxu0 %v962_v41 }
 0x3bb   :  { %675 = vmatpush.msrb.mxu3 %v655_v11  ;;  %v871_v11 = vld [vmem:[%s2776_s8 + $0x18] sm:$0xff] }
 0x3bc   :  { %894 = vmatpush.msrb.mxu2 %v871_v11  ;;  %v1891_v11 = vld [vmem:[%s2779_s11] ss:$0 sm:$0xff]  ;;  %s2808_s11 = sld [smem:[#allocation30_spill]] }
 0x3be   :  { %895 = vmatpush.msrb.mxu2 %v870_v57 }
 0x3c0   :  { %896 = vmatpush.msrb.mxu2 %v869_v12 }
 0x3c2   :  { %1796 = vmatmul.msk.f32.vlgmr.msra.gmra.mxu3 %vm318_vm8, %v522_v42  ;;  %897 = vmatpush.msrb.mxu2 %v868_v13  ;;  %v960_v42 = vld [vmem:[%s2778_s10 + $0x8] sm:$0xff]  ;;  %s1767_s25 = sshll.u32 %s2808_s11, 4  ;;  %s1768_s25 = int_to_ptr.hbm [resolvable:$true] %s1767_s25 }
 0x3c3   :  { %805 = vmatpush.msra.mxu3 %v785_v43  ;;  %v959_v43 = vld [vmem:[%s2778_s10] sm:$0xff] }
 0x3cc   :  { %v681_v55 = vpop.permute.xlu0 %680 }
 0x3d3   :  { %v649_v49 = vpop.xlane.xlu1 %648 }
 0x3d9   :  { %v646_v44 = vpop.xlane.xlu2 %645 }
 0x3da   :  { %1924 = vrcp.f32 %v646_v44  ;;  %v957_v44 = vld [vmem:[#allocation5] sm:$0xff] }
 0x3db   :  { %1926 = vrcp.f32 %v519_v45 }
 0x3e0   :  { %v1925_v46 = vpop.eup %1924 }
 0x3e1   :  { %v652_v47 = vmul.f32 %v1925_v46, %v1913_v23  ;;  %v776_v48 = vpop.xlane.xlu2 %775  ;;  %v1927_v50 = vpop.eup %1926 }
 0x3e2   :  { %1928 = vrcp.f32 %v776_v48  ;;  %v523_v52 = vmul.f32 %v1927_v50, %v2510_v8  ;;  %v958_v50 = vld [vmem:[#allocation5 + $0x8] sm:$0xff] }
 0x3e3   :  { %1802 = vmatmul.msk.f32.vlgmr.msrb.gmra.mxu3 %vm318_vm8, %v652_v47  ;;  %1930 = vrcp.f32 %v649_v49 }
 0x3e8   :  { %v1929_v51 = vpop.eup %1928 }
 0x3e9   :  { %v782_v53 = vmul.f32 %v1929_v51, %v1915_v25  ;;  %v551_v54 = vpop.permute.xlu2 %550  ;;  %v1931_v58 = vpop.eup %1930  ;;  %v999_v51 = vld [vmem:[#allocation13 + $0x18] sm:$0xff] }
 0x3ea   :  { %571 = vmatpush.msra.mxu1 %v551_v54  ;;  %v653_v59 = vmul.f32 %v1931_v58, %v2516_v17  ;;  %1022 = vmatpush.msrb.mxu3 %v999_v51  ;;  %v996_v54 = vld [vmem:[#allocation13] sm:$0xff] }
 0x3eb   :  { %v811_v56 = vpop.permute.xlu1 %810  ;;  %1797 = vmatmul.msk.f32.vlgmr.msra.gmra.mxu1 %vm318_vm8, %v523_v52  ;;  %1808 = vmatmul.msk.f32.vlgmr.msra.gmra.mxu3 %vm318_vm8, %v782_v53  ;;  %v998_v52 = vld [vmem:[#allocation13 + $0x10] sm:$0xff]  ;;  %v997_v53 = vld [vmem:[#allocation13 + $0x8] sm:$0xff] }
 0x3ec   :  { %701 = vmatpush.msrb.mxu1 %v681_v55  ;;  %1023 = vmatpush.msrb.mxu3 %v998_v52  ;;  %v211_v52 = vld [vmem:[#allocation8 + $0x1] sm:$0x1] }
 0x3ed   :  { %vm213_vm5 = vcmp.gt.f32.partialorder %v211_v52, 0.0 }
 0x3ee   :  { %831 = vmatpush.msra.mxu1 %v811_v56  ;;  %1024 = vmatpush.msrb.mxu3 %v997_v53  ;;  %v215_v53 = vsel %vm213_vm5, 0.0, %v2250_v20 }
 0x3f0   :  { %1025 = vmatpush.msrb.mxu3 %v996_v54 }
 0x3f3   :  { %1803 = vmatmul.msk.f32.vlgmr.msrb.gmra.mxu1 %vm318_vm8, %v653_v59 }
 0x41d   :  { %v417_v1 = vpop.f32.mrf.mxu3 }
 0x422   :  { %v779_v61 = vpop.xlane.xlu2 %778 }
 0x423   :  { %1932 = vrcp.f32 %v779_v61 }
 0x429   :  { %v1933_v62 = vpop.eup %1932 }
 0x42a   :  { %v783_v63 = vmul.f32 %v1933_v62, %v1919_v34 }
 0x42c   :  { %1809 = vmatmul.msk.f32.vlgmr.msra.gmra.mxu1 %vm318_vm8, %v783_v63 }
 0x43d   :  { %v443_v3 = vpop.f32.mrf.mxu3 }
 0x445   :  { %v547_v4 = vpop.f32.mrf.mxu3 }
 0x446   :  { %838 = vrot.lane.b32.xlu0 %v547_v4, %s2803_s0  ;;  %v951_v4 = vperm.slane %v2438_v36, 1 }
 0x466   :  { %v677_v5 = vpop.f32.mrf.mxu3 }
 0x467   :  { %846 = vrot.lane.b32.xlu2 %v677_v5, %s2232_s21 }
 0x468   :  { %v573_v6 = vpop.f32.mrf.mxu1 }
 0x469   :  { %840 = vrot.lane.b32.xlu0 %v573_v6, %s2803_s0  ;;  %v954_v6 = vperm.slane %v2440_v40, 1 }
 0x46e   :  { %v807_v7 = vpop.f32.mrf.mxu3 }
 0x46f   :  { %854 = vrot.lane.b32.xlu1 %v807_v7, %s2254_s16 }
 0x470   :  { %v703_v8 = vpop.f32.mrf.mxu1 }
 0x477   :  { %848 = vrot.lane.b32.xlu1 %v703_v8, %s2232_s21 }
 0x4a9   :  { %v833_v9 = vpop.f32.mrf.mxu1 }
 0x4aa   :  { %856 = vrot.lane.b32.xlu0 %v833_v9, %s2254_s16 }
 0x4b8   :  { %v839_v14 = vpop.permute.xlu0 %838 }
 0x4b9   :  { %v860_v16 = vsel %vm318_vm8, %v417_v1, %v839_v14 }
 0x4c1   :  { %v847_v15 = vpop.permute.xlu2 %846 }
 0x4c2   :  { %v863_v17 = vsel %vm862_vm11, %v860_v16, %v847_v15 }
 0x4db   :  { %v841_v21 = vpop.permute.xlu0 %840 }
 0x4dc   :  { %v861_v23 = vsel %vm318_vm8, %v443_v3, %v841_v21 }
 0x4e1   :  { %v855_v18 = vpop.permute.xlu1 %854 }
 0x4e2   :  { %v866_v19 = vsel %vm865_vm12, %v863_v17, %v855_v18 }
 0x4e3   :  { %1810 = vmatmul.msk.f32.vlgmr.msrb.gmra.mxu2 %vm218_vm0, %v866_v19 }
 0x4e9   :  { %v849_v22 = vpop.permute.xlu1 %848 }
 0x4ea   :  { %v864_v24 = vsel %vm862_vm11, %v861_v23, %v849_v22 }
 0x51c   :  { %v857_v25 = vpop.permute.xlu0 %856 }
 0x51d   :  { %v867_v26 = vsel %vm865_vm12, %v864_v24, %v857_v25 }
 0x51e   :  { %1811 = vmatmul.msk.f32.gmra.mxu2 %vm218_vm0, %v867_v26 }
 0x566   :  { %v899_v28 = vpop.f32.mrf.mxu2 }
 0x567   :  { %v900_v29 = vadd.f32 %v1890_v27, %v899_v28 }
 0x569   :  { %v2568_v30 = vadd.f32 %v900_v29, %v2408_v0 }
 0x56b   :  { %v907_v31 = vsel %vm218_vm0, %v2568_v30, 0.0 }
 0x56c   :  { %908 = vadd.xlane.f32.xlu1 %v907_v31 }
 0x5a1   :  { %v902_v32 = vpop.f32.mrf.mxu2 }
 0x5a2   :  { %v903_v33 = vadd.f32 %v1890_v27, %v902_v32  ;;  %v1892_v27 = vld [vmem:[%s2781_s13] ss:$0 sm:$0xff] }
 0x5a4   :  { %v2573_v34 = vadd.f32 %v903_v33, %v2412_v2  ;;  %v961_v2 = vld [vmem:[%s2778_s10 + $0x10] sm:$0xff] }
 0x5a5   :  { %986 = vmatpush.msra.mxu0 %v961_v2  ;;  %v210_v2 = vld [vmem:[#allocation8] sm:$0x1] }
 0x5a6   :  { %v910_v35 = vsel %vm218_vm0, %v2573_v34, 0.0  ;;  %vm212_vm4 = vcmp.gt.f32.partialorder %v210_v2, 0.0 }
 0x5a7   :  { %911 = vadd.xlane.f32.xlu0 %v910_v35  ;;  %987 = vmatpush.msra.mxu0 %v960_v42  ;;  %v214_v42 = vsel %vm212_vm4, 0.0, %v2250_v20 }
 0x5a9   :  { %988 = vmatpush.msra.mxu0 %v959_v43 }
 0x5aa   :  { %1812 = vmatmul.msk.f32.vlgmr.msra.gmra.mxu0 %vm218_vm0, %v957_v44  ;;  %v1037_v44 = vperm.slane %v214_v42, 0 }
 0x5b2   :  { %1813 = vmatmul.msk.f32.gmra.mxu0 %vm218_vm0, %v958_v50 }
 0x5df   :  { %v909_v37 = vpop.xlane.xlu1 %908 }
 0x5e0   :  { %v913_v60 = vmul.f32 %v909_v37, %v2416_v10 }
 0x5e2   :  { %v915_v38 = vsub.f32 %v2568_v30, %v913_v60 }
 0x5e4   :  { %v917_v0 = vmul.f32 %v915_v38, %v915_v38 }
 0x5e6   :  { %v919_v39 = vsel %vm218_vm0, %v917_v0, 0.0 }
 0x5e7   :  { %920 = vadd.xlane.f32.xlu2 %v919_v39 }
 0x61a   :  { %v912_v45 = vpop.xlane.xlu0 %911 }
 0x61b   :  { %v914_v46 = vmul.f32 %v912_v45, %v2416_v10 }
 0x61d   :  { %v916_v47 = vsub.f32 %v2573_v34, %v914_v46 }
 0x61f   :  { %v918_v48 = vmul.f32 %v916_v47, %v916_v47 }
 0x621   :  { %v922_v49 = vsel %vm218_vm0, %v918_v48, 0.0 }
 0x622   :  { %923 = vadd.xlane.f32.xlu1 %v922_v49 }
 0x627   :  { %v990_v57 = vpop.f32.mrf.mxu0 }
 0x628   :  { %v2604_v12 = vadd.f32 %v1891_v11, %v990_v57 }
 0x62a   :  { %1169 = vrot.lane.b32.xlu0 %v2604_v12, %s2244_s22  ;;  %1816 = vmatpush.xpose.msk.msrb.mxu1 %vm318_vm8, %v2604_v12 }
 0x62f   :  { %v993_v25 = vpop.f32.mrf.mxu0 }
 0x630   :  { %v2614_v26 = vadd.f32 %v1891_v11, %v993_v25 }
 0x632   :  { %1818 = vmatpush.xpose.msk.msra.mxu1 %vm318_vm8, %v2614_v26  ;;  %v1879_v20 = vpack.i.bf16 %v2614_v26, %v2604_v12 }
 0x63b   :  { %1299 = vrot.lane.b32.xlu1 %v2604_v12, %s2248_s14 }
 0x643   :  { %1197 = vrot.lane.b32.xlu1 %v2614_v26, %s2244_s22 }
 0x65a   :  { %v921_v55 = vpop.xlane.xlu2 %920 }
 0x65b   :  { %v925_v56 = vmul.f32 %v921_v55, %v2416_v10  ;;  %v1038_v55 = vperm.slane %v215_v53, 0 }
 0x65d   :  { %v927_v58 = vadd.f32 1e-06, %v925_v56 }
 0x65f   :  { %1934 = vrsqrt.f32 %v927_v58  ;;  %vm935_vm14 = vweird.f32 %v927_v58 }
 0x665   :  { %v1935_v59 = vpop.eup %1934 }
 0x666   :  { %v930_v61 = vmul.f32 %v1935_v59, %v927_v58  ;;  %vm936_vm13 = vweird.f32 %v1935_v59 }
 0x667   :  { %vm937_vm15 = vmor %vm935_vm14, %vm936_vm13 }
 0x668   :  { %v931_v62 = vmul.f32 %v1935_v59, %v930_v61 }
 0x66a   :  { %v932_v63 = vmul.f32 0.5, %v931_v62 }
 0x66c   :  { %v933_v1 = vsub.f32 1.5, %v932_v63 }
 0x66e   :  { %v934_v3 = vmul.f32 %v1935_v59, %v933_v1 }
 0x670   :  { %v938_v5 = vsel %vm937_vm15, %v1935_v59, %v934_v3 }
 0x671   :  { %v949_v7 = vmul.f32 %v938_v5, %v915_v38 }
 0x673   :  { %v952_v8 = vmul.f32 %v951_v4, %v949_v7 }
 0x675   :  { %v955_v9 = vadd.f32 %v954_v6, %v952_v8 }
 0x677   :  { %1814 = vmatmul.msk.f32.vlgmr.msrb.gmra.mxu3 %vm218_vm0, %v955_v9 }
 0x695   :  { %v924_v13 = vpop.xlane.xlu1 %923 }
 0x696   :  { %v926_v14 = vmul.f32 %v924_v13, %v2416_v10 }
 0x698   :  { %v928_v36 = vadd.f32 1e-06, %v926_v14 }
 0x69a   :  { %1936 = vrsqrt.f32 %v928_v36  ;;  %vm945_vm2 = vweird.f32 %v928_v36 }
 0x69c   :  { %v1170_v32 = vpop.permute.xlu0 %1169 }
 0x69d   :  { %1822 = vmatpush.xpose.msk.msra.mxu3 %vm318_vm8, %v1170_v32 }
 0x6a0   :  { %v1937_v40 = vpop.eup %1936 }
 0x6a1   :  { %v940_v15 = vmul.f32 %v1937_v40, %v928_v36  ;;  %vm946_vm1 = vweird.f32 %v1937_v40 }
 0x6a2   :  { %vm947_vm3 = vmor %vm945_vm2, %vm946_vm1 }
 0x6a3   :  { %v941_v16 = vmul.f32 %v1937_v40, %v940_v15 }
 0x6a5   :  { %v942_v17 = vmul.f32 0.5, %v941_v16 }
 0x6a7   :  { %v943_v18 = vsub.f32 1.5, %v942_v17 }
 0x6a9   :  { %v944_v19 = vmul.f32 %v1937_v40, %v943_v18 }
 0x6ab   :  { %v948_v21 = vsel %vm947_vm3, %v1937_v40, %v944_v19 }
 0x6ac   :  { %v950_v22 = vmul.f32 %v948_v21, %v916_v47 }
 0x6ad   :  { %v1300_v33 = vpop.permute.xlu1 %1299 }
 0x6ae   :  { %v953_v23 = vmul.f32 %v951_v4, %v950_v22  ;;  %1828 = vmatpush.xpose.msk.msrb.mxu3 %vm318_vm8, %v1300_v33 }
 0x6b0   :  { %v956_v24 = vadd.f32 %v954_v6, %v953_v23 }
 0x6b2   :  { %1815 = vmatmul.msk.f32.gmra.mxu3 %vm218_vm0, %v956_v24 }
 0x6b5   :  { %v1198_v39 = vpop.permute.xlu1 %1197 }
 0x6fa   :  { %v1027_v28 = vpop.f32.mrf.mxu3 }
 0x6fb   :  { %v1028_v29 = vadd.f32 %v1892_v27, %v1027_v28 }
 0x6fd   :  { %v1033_v31 = vmul.f32 0.35355338, %v1028_v29 }
 0x6ff   :  { %1297 = vrot.lane.b32.xlu0 %v1033_v31, %s2248_s14  ;;  %1167 = vrot.lane.b32.xlu2 %v1033_v31, %s2244_s22 }
 0x700   :  { %1817 = vmatmul.msk.f32.vlgmr.msrb.gmra.mxu1 %vm318_vm8, %v1033_v31 }
 0x701   :  { %1824 = vmatpush.xpose.msk.msrb.mxu1 %vm318_vm8, %v1198_v39 }
 0x707   :  { %1427 = vrot.lane.b32.xlu0 %v1033_v31, %s2247_s20  ;;  %1429 = vrot.lane.b32.xlu2 %v2604_v12, %s2247_s20 }
 0x70f   :  { %1327 = vrot.lane.b32.xlu0 %v2614_v26, %s2248_s14 }
 0x735   :  { %v1030_v35 = vpop.f32.mrf.mxu3 }
 0x736   :  { %v1031_v37 = vadd.f32 %v1892_v27, %v1030_v35 }
 0x738   :  { %v1034_v60 = vmul.f32 0.35355338, %v1031_v37 }
 0x73a   :  { %1455 = vrot.lane.b32.xlu0 %v1034_v60, %s2247_s20  ;;  %1325 = vrot.lane.b32.xlu1 %v1034_v60, %s2248_s14 }
 0x73b   :  { %1195 = vrot.lane.b32.xlu2 %v1034_v60, %s2244_s22  ;;  %1819 = vmatmul.msk.f32.vlgmr.msra.gmra.mxu1 %vm318_vm8, %v1034_v60 }
 0x743   :  { %1457 = vrot.lane.b32.xlu2 %v2614_v26, %s2247_s20 }
 0x759   :  { %v1168_v38 = vpop.permute.xlu2 %1167 }
 0x75a   :  { %1823 = vmatmul.msk.f32.vlgmr.msra.gmra.mxu3 %vm318_vm8, %v1168_v38 }
 0x761   :  { %v1430_v0 = vpop.permute.xlu2 %1429 }
 0x762   :  { %1834 = vmatpush.xpose.msk.msra.mxu3 %vm318_vm8, %v1430_v0 }
 0x771   :  { %v1298_v41 = vpop.permute.xlu0 %1297 }
 0x772   :  { %1829 = vmatmul.msk.f32.vlgmr.msrb.gmra.mxu3 %vm318_vm8, %v1298_v41 }
 0x779   :  { %v1428_v43 = vpop.permute.xlu0 %1427 }
 0x77a   :  { %1835 = vmatmul.msk.f32.vlgmr.msra.gmra.mxu3 %vm318_vm8, %v1428_v43 }
 0x77d   :  { %v1064_v45 = vpop.f32.mrf.mxu1 }
 0x77e   :  { %v1065_v46 = vadd.f32 %v1064_v45, %v1037_v44 }
 0x780   :  { %v1093_v47 = vsel %vm318_vm8, %v1065_v46, -inf }
 0x781   :  { %1094 = vmax.xlane.f32.xlu1 %v1093_v47  ;;  %v1328_v48 = vpop.permute.xlu0 %1327 }
 0x782   :  { %1830 = vmatpush.xpose.msk.msra.mxu1 %vm318_vm8, %v1328_v48 }
 0x795   :  { %v1196_v49 = vpop.permute.xlu2 %1195 }
 0x796   :  { %1825 = vmatmul.msk.f32.vlgmr.msrb.gmra.mxu1 %vm318_vm8, %v1196_v49 }
 0x79d   :  { %v1458_v50 = vpop.permute.xlu2 %1457 }
 0x79e   :  { %1836 = vmatpush.xpose.msk.msrb.mxu1 %vm318_vm8, %v1458_v50 }
 0x7ac   :  { %v1326_v51 = vpop.permute.xlu1 %1325  ;;  %v1456_v54 = vpop.permute.xlu0 %1455 }
 0x7ad   :  { %1831 = vmatmul.msk.f32.vlgmr.msra.gmra.mxu1 %vm318_vm8, %v1326_v51 }
 0x7b5   :  { %1837 = vmatmul.msk.f32.vlgmr.msrb.gmra.mxu1 %vm318_vm8, %v1456_v54 }
 0x7b8   :  { %v1090_v56 = vpop.f32.mrf.mxu1 }
 0x7b9   :  { %v1091_v58 = vadd.f32 %v1090_v56, %v1038_v55 }
 0x7bb   :  { %v1096_v59 = vsel %vm318_vm8, %v1091_v58, -inf }
 0x7bc   :  { %1097 = vmax.xlane.f32.xlu0 %v1096_v59 }
 0x7dd   :  { %v1192_v61 = vpop.f32.mrf.mxu3 }
 0x7de   :  { %v1193_v62 = vadd.f32 %v1192_v61, %v1037_v44 }
 0x7e0   :  { %v1223_v63 = vsel %vm318_vm8, %v1193_v62, -inf }
 0x7e1   :  { %1224 = vmax.xlane.f32.xlu2 %v1223_v63 }
 0x7f4   :  { %v1095_v1 = vpop.xlane.xlu1 %1094 }
 0x7f5   :  { %v1099_v3 = vsub.f32 %v1065_v46, %v1095_v1  ;;  %v1322_v4 = vpop.f32.mrf.mxu3 }
 0x7f6   :  { %v1323_v5 = vadd.f32 %v1322_v4, %v1037_v44 }
 0x7f7   :  { %v1101_v6 = vmul.f32 1.442695, %v1099_v3 }
 0x7f8   :  { %v1353_v7 = vsel %vm318_vm8, %v1323_v5, -inf }
 0x7f9   :  { %1938 = vpow2.f32 %v1101_v6  ;;  %1880 = vrot.lane.b32.xlu2 %v1879_v20, %s2249_s4  ;;  %1354 = vmax.xlane.f32.xlu1 %v1353_v7 }
 0x7fd   :  { %v1452_v24 = vpop.f32.mrf.mxu3 }
 0x7fe   :  { %v2663_v25 = vadd.f32 %v1452_v24, %v1037_v44 }
 0x7ff   :  { %v1939_v8 = vpop.eup %1938 }
 0x800   :  { %v1105_v9 = vsel %vm318_vm8, %v1939_v8, 0.0  ;;  %v1483_v27 = vsel %vm318_vm8, %v2663_v25, -inf }
 0x801   :  { %1106 = vadd.xlane.f32.xlu0 %v1105_v9 }
 0x813   :  { %v1220_v11 = vpop.f32.mrf.mxu1 }
 0x814   :  { %v1221_v57 = vadd.f32 %v1220_v11, %v1038_v55 }
 0x816   :  { %v1226_v13 = vsel %vm318_vm8, %v1221_v57, -inf }
 0x822   :  { %1227 = vmax.xlane.f32.xlu2 %v1226_v13 }
 0x82a   :  { %v1350_v14 = vpop.f32.mrf.mxu1 }
 0x82b   :  { %v1351_v36 = vadd.f32 %v1350_v14, %v1038_v55 }
 0x82d   :  { %v1356_v40 = vsel %vm318_vm8, %v1351_v36, -inf }
 0x82e   :  { %1357 = vmax.xlane.f32.xlu1 %v1356_v40 }
 0x82f   :  { %v1098_v15 = vpop.xlane.xlu0 %1097 }
 0x830   :  { %v1100_v16 = vsub.f32 %v1091_v58, %v1098_v15 }
 0x832   :  { %v1103_v17 = vmul.f32 1.442695, %v1100_v16  ;;  %v1480_v18 = vpop.f32.mrf.mxu1 }
 0x833   :  { %v1481_v19 = vadd.f32 %v1480_v18, %v1038_v55 }
 0x834   :  { %1940 = vpow2.f32 %v1103_v17 }
 0x835   :  { %v1486_v21 = vsel %vm318_vm8, %v1481_v19, -inf }
 0x836   :  { %1487 = vmax.xlane.f32.xlu2 %v1486_v21 }
 0x83a   :  { %v1941_v22 = vpop.eup %1940 }
 0x83b   :  { %v1108_v23 = vsel %vm318_vm8, %v1941_v22, 0.0 }
 0x83c   :  { %1109 = vadd.xlane.f32.xlu0 %v1108_v23 }
 0x844   :  { %1484 = vmax.xlane.f32.xlu0 %v1483_v27 }
 0x84e   :  { %1375 = vrot.lane.b32.xlu2 %v2604_v12, %s2251_s3 }
 0x854   :  { %v1225_v28 = vpop.xlane.xlu2 %1224 }
 0x855   :  { %v1229_v29 = vsub.f32 %v1193_v62, %v1225_v28 }
 0x857   :  { %v1231_v31 = vmul.f32 1.442695, %v1229_v29 }
 0x858   :  { %1885 = vrot.lane.b32.xlu0 %v1879_v20, %s2252_s19 }
 0x859   :  { %1942 = vpow2.f32 %v1231_v31 }
 0x85c   :  { %v1881_v32 = vpop.permute.xlu2 %1880 }
 0x85d   :  { %v1883_v33 = vunpack.i.h.bf16 %v1881_v32  ;;  %v1882_v35 = vunpack.i.l.bf16 %v1881_v32 }
 0x85f   :  { %v1943_v37 = vpop.eup %1942  ;;  %1136 = vmatpush.msra.mxu2 %v1882_v35  ;;  %1162 = vmatpush.msrb.mxu0 %v1883_v33 }
 0x860   :  { %v1235_v60 = vsel %vm318_vm8, %v1943_v37, 0.0 }
 0x861   :  { %1236 = vadd.xlane.f32.xlu1 %v1235_v60 }
 0x86c   :  { %v1355_v41 = vpop.xlane.xlu1 %1354 }
 0x86d   :  { %v1359_v43 = vsub.f32 %v1323_v5, %v1355_v41  ;;  %v1588_v41 = vld [vmem:[#allocation14 + $0x8] sm:$0xff] }
 0x86f   :  { %v1361_v45 = vmul.f32 1.442695, %v1359_v43  ;;  %v1587_v43 = vld [vmem:[#allocation14] sm:$0xff] }
 0x874   :  { %v1107_v38 = vpop.xlane.xlu0 %1106 }
 0x875   :  { %1944 = vrcp.f32 %v1107_v38 }
 0x87b   :  { %v1945_v0 = vpop.eup %1944 }
 0x87c   :  { %v1113_v39 = vmul.f32 %v1945_v0, %v1939_v8  ;;  %v1590_v0 = vld [vmem:[#allocation14 + $0x18] sm:$0xff] }
 0x87d   :  { %1613 = vmatpush.msrb.mxu3 %v1590_v0 }
 0x87e   :  { %1820 = vmatmul.msk.f32.vlgmr.msra.gmra.mxu2 %vm318_vm8, %v1113_v39  ;;  %v1589_v39 = vld [vmem:[#allocation14 + $0x10] sm:$0xff] }
 0x87f   :  { %1614 = vmatpush.msrb.mxu3 %v1589_v39 }
 0x881   :  { %1615 = vmatpush.msrb.mxu3 %v1588_v41 }
 0x883   :  { %1616 = vmatpush.msrb.mxu3 %v1587_v43 }
 0x895   :  { %v1228_v2 = vpop.xlane.xlu2 %1227 }
 0x896   :  { %v1230_v42 = vsub.f32 %v1221_v57, %v1228_v2 }
 0x898   :  { %v1233_v44 = vmul.f32 1.442695, %v1230_v42 }
 0x89a   :  { %1946 = vpow2.f32 %v1233_v44 }
 0x89b   :  { %1948 = vpow2.f32 %v1361_v45 }
 0x8a0   :  { %v1947_v46 = vpop.eup %1946 }
 0x8a1   :  { %v1358_v47 = vpop.xlane.xlu1 %1357  ;;  %v1238_v48 = vsel %vm318_vm8, %v1947_v46, 0.0  ;;  %v1949_v51 = vpop.eup %1948 }
 0x8a2   :  { %v1360_v49 = vsub.f32 %v1351_v36, %v1358_v47  ;;  %1239 = vadd.xlane.f32.xlu1 %v1238_v48  ;;  %v1365_v53 = vsel %vm318_vm8, %v1949_v51, 0.0 }
 0x8a4   :  { %v1363_v50 = vmul.f32 1.442695, %v1360_v49 }
 0x8a6   :  { %1950 = vpow2.f32 %v1363_v50 }
 0x8a9   :  { %v1488_v52 = vpop.xlane.xlu2 %1487 }
 0x8aa   :  { %v1490_v54 = vsub.f32 %v1481_v19, %v1488_v52  ;;  %1366 = vadd.xlane.f32.xlu1 %v1365_v53 }
 0x8ac   :  { %v1951_v55 = vpop.eup %1950  ;;  %v1493_v56 = vmul.f32 1.442695, %v1490_v54 }
 0x8ad   :  { %v1368_v58 = vsel %vm318_vm8, %v1951_v55, 0.0 }
 0x8ae   :  { %1952 = vpow2.f32 %v1493_v56  ;;  %1369 = vadd.xlane.f32.xlu0 %v1368_v58  ;;  %v1893_v56 = vld [vmem:[%s2783_s15] ss:$0 sm:$0xff] }
 0x8af   :  { %v1110_v59 = vpop.xlane.xlu0 %1109 }
 0x8b0   :  { %1954 = vrcp.f32 %v1110_v59 }
 0x8b1   :  { %v1376_v20 = vpop.permute.xlu2 %1375 }
 0x8b4   :  { %v1953_v61 = vpop.eup %1952 }
 0x8b5   :  { %v1498_v62 = vsel %vm318_vm8, %v1953_v61, 0.0 }
 0x8b6   :  { %v1955_v63 = vpop.eup %1954  ;;  %1499 = vadd.xlane.f32.xlu2 %v1498_v62 }
 0x8b7   :  { %v1114_v1 = vmul.f32 %v1955_v63, %v1941_v22  ;;  %v1485_v3 = vpop.xlane.xlu0 %1484 }
 0x8b8   :  { %v1489_v9 = vsub.f32 %v2663_v25, %v1485_v3 }
 0x8b9   :  { %1821 = vmatmul.msk.f32.vlgmr.msrb.gmra.mxu0 %vm318_vm8, %v1114_v1 }
 0x8ba   :  { %v1491_v57 = vmul.f32 1.442695, %v1489_v9 }
 0x8c3   :  { %1505 = vrot.lane.b32.xlu1 %v2604_v12, %s2253_s12 }
 0x8ca   :  { %v1886_v4 = vpop.permute.xlu0 %1885 }
 0x8cb   :  { %v1888_v5 = vunpack.i.h.bf16 %v1886_v4  ;;  %v1887_v6 = vunpack.i.l.bf16 %v1886_v4 }
 0x8cd   :  { %1266 = vmatpush.msrb.mxu2 %v1887_v6  ;;  %1292 = vmatpush.msra.mxu0 %v1888_v5 }
 0x8cf   :  { %1396 = vmatpush.msra.mxu2 %v1376_v20 }
 0x8d4   :  { %v1237_v7 = vpop.xlane.xlu1 %1236 }
 0x8d5   :  { %1956 = vrcp.f32 %v1237_v7 }
 0x8d6   :  { %1958 = vpow2.f32 %v1491_v57 }
 0x8db   :  { %v1957_v8 = vpop.eup %1956 }
 0x8dc   :  { %v1243_v11 = vmul.f32 %v1957_v8, %v1943_v37  ;;  %v1959_v13 = vpop.eup %1958 }
 0x8dd   :  { %v1495_v12 = vsel %vm318_vm8, %v1959_v13, 0.0 }
 0x8de   :  { %1826 = vmatmul.msk.f32.vlgmr.msrb.gmra.mxu2 %vm318_vm8, %v1243_v11 }
 0x8ed   :  { %1496 = vadd.xlane.f32.xlu1 %v1495_v12  ;;  %v1678_v12 = vld [vmem:[#allocation16 + $0x10] sm:$0xff] }
 0x901   :  { %v1138_v19 = vpop.f32.mrf.mxu2 }
 0x906   :  { %1401 = vrot.lane.b32.xlu1 %v2614_v26, %s2251_s3 }
 0x90e   :  { %1531 = vrot.lane.b32.xlu1 %v2614_v26, %s2253_s12 }
 0x915   :  { %v1240_v14 = vpop.xlane.xlu1 %1239 }
 0x916   :  { %1960 = vrcp.f32 %v1240_v14  ;;  %v1677_v14 = vld [vmem:[#allocation16 + $0x8] sm:$0xff] }
 0x91c   :  { %v1961_v36 = vpop.eup %1960 }
 0x91d   :  { %v1244_v40 = vmul.f32 %v1961_v36, %v1947_v46  ;;  %v1367_v15 = vpop.xlane.xlu1 %1366  ;;  %v1676_v36 = vld [vmem:[#allocation16] sm:$0xff] }
 0x91e   :  { %1962 = vrcp.f32 %v1367_v15 }
 0x91f   :  { %1827 = vmatmul.msk.f32.vlgmr.msra.gmra.mxu0 %vm318_vm8, %v1244_v40 }
 0x921   :  { %v1370_v24 = vpop.xlane.xlu0 %1369 }
 0x924   :  { %v1963_v16 = vpop.eup %1962 }
 0x925   :  { %v1373_v17 = vmul.f32 %v1963_v16, %v1949_v51 }
 0x927   :  { %1832 = vmatmul.msk.f32.vlgmr.msra.gmra.mxu2 %vm318_vm8, %v1373_v17 }
 0x929   :  { %v1500_v25 = vpop.xlane.xlu2 %1499 }
 0x935   :  { %v1506_v18 = vpop.permute.xlu1 %1505 }
 0x936   :  { %1526 = vmatpush.msrb.mxu2 %v1506_v18  ;;  %v1164_v35 = vpop.f32.mrf.mxu0 }
 0x960   :  { %v1497_v21 = vpop.xlane.xlu1 %1496 }
 0x961   :  { %1964 = vrcp.f32 %v1497_v21  ;;  %v1268_v22 = vpop.f32.mrf.mxu2  ;;  %v1722_v21 = vld [vmem:[%s2786_s18 + $0x38] sm:$0xff] }
 0x962   :  { %1559 = vrot.lane.b32.xlu1 %v1268_v22, %s2803_s0  ;;  %1966 = vrcp.f32 %v1370_v24  ;;  %v1721_v22 = vld [vmem:[%s2786_s18 + $0x30] sm:$0xff]  ;;  %1742 = vmatpush.msra.mxu2 %v1722_v21 }
 0x963   :  { %1968 = vrcp.f32 %v1500_v25 }
 0x964   :  { %1743 = vmatpush.msra.mxu2 %v1721_v22 }
 0x967   :  { %v1965_v26 = vpop.eup %1964 }
 0x968   :  { %v1503_v23 = vmul.f32 %v1965_v26, %v1959_v13  ;;  %v1967_v27 = vpop.eup %1966  ;;  %v1679_v13 = vld [vmem:[#allocation16 + $0x18] sm:$0xff] }
 0x969   :  { %v1374_v28 = vmul.f32 %v1967_v27, %v1951_v55  ;;  %v1969_v31 = vpop.eup %1968  ;;  %1702 = vmatpush.msra.mxu1 %v1679_v13 }
 0x96a   :  { %1838 = vmatmul.msk.f32.vlgmr.msrb.gmra.mxu2 %vm318_vm8, %v1503_v23  ;;  %v1504_v32 = vmul.f32 %v1969_v31, %v1953_v61  ;;  %v1720_v23 = vld [vmem:[%s2786_s18 + $0x28] sm:$0xff]  ;;  %v1974_v31 = vld [vmem:[#allocation10] sm:$0x7] }
 0x96b   :  { %1703 = vmatpush.msra.mxu1 %v1678_v12  ;;  %1744 = vmatpush.msra.mxu2 %v1720_v23 }
 0x96d   :  { %1704 = vmatpush.msra.mxu1 %v1677_v14 }
 0x96f   :  { %1705 = vmatpush.msra.mxu1 %v1676_v36 }
 0x978   :  { %v1402_v29 = vpop.permute.xlu1 %1401 }
 0x979   :  { %1422 = vmatpush.msrb.mxu0 %v1402_v29 }
 0x97a   :  { %1833 = vmatmul.msk.f32.vlgmr.msrb.gmra.mxu0 %vm318_vm8, %v1374_v28  ;;  %v1719_v28 = vld [vmem:[%s2786_s18 + $0x20] sm:$0xff] }
 0x97b   :  { %1745 = vmatpush.msra.mxu2 %v1719_v28 }
 0x980   :  { %v1532_v33 = vpop.permute.xlu1 %1531 }
 0x981   :  { %1552 = vmatpush.msra.mxu0 %v1532_v33 }
 0x982   :  { %1839 = vmatmul.msk.f32.vlgmr.msra.gmra.mxu0 %vm318_vm8, %v1504_v32  ;;  %v1670_v32 = vperm.slane %v1974_v31, 2 }
 0x99c   :  { %v1294_v37 = vpop.f32.mrf.mxu0 }
 0x99d   :  { %1561 = vrot.lane.b32.xlu1 %v1294_v37, %s2803_s0 }
 0x9aa   :  { %v1398_v60 = vpop.f32.mrf.mxu2 }
 0x9ab   :  { %1567 = vrot.lane.b32.xlu2 %v1398_v60, %s2232_s21  ;;  %v1975_v60 = vld [vmem:[#allocation11] sm:$0x7] }
 0x9d4   :  { %v1560_v44 = vpop.permute.xlu1 %1559 }
 0x9d5   :  { %v1581_v46 = vsel %vm318_vm8, %v1138_v19, %v1560_v44 }
 0x9ed   :  { %v1528_v38 = vpop.f32.mrf.mxu2 }
 0x9ee   :  { %1575 = vrot.lane.b32.xlu0 %v1528_v38, %s2254_s16  ;;  %v1673_v38 = vperm.slane %v1975_v60, 2 }
 0x9f7   :  { %v1424_v2 = vpop.f32.mrf.mxu0 }
 0x9f8   :  { %1569 = vrot.lane.b32.xlu1 %v1424_v2, %s2232_s21 }
 0x9ff   :  { %v1554_v42 = vpop.f32.mrf.mxu0 }
 0xa00   :  { %1577 = vrot.lane.b32.xlu0 %v1554_v42, %s2254_s16 }
 0xa05   :  { %v1568_v45 = vpop.permute.xlu2 %1567 }
 0xa06   :  { %v1583_v47 = vsel %vm862_vm11, %v1581_v46, %v1568_v45 }
 0xa0f   :  { %v1562_v50 = vpop.permute.xlu1 %1561 }
 0xa10   :  { %v1582_v52 = vsel %vm318_vm8, %v1164_v35, %v1562_v50  ;;  %v1718_v35 = vld [vmem:[%s2786_s18 + $0x18] sm:$0xff]  ;;  %v1717_v50 = vld [vmem:[%s2786_s18 + $0x10] sm:$0xff] }
 0xa11   :  { %1746 = vmatpush.msra.mxu2 %v1718_v35 }
 0xa13   :  { %1747 = vmatpush.msra.mxu2 %v1717_v50 }
 0xa60   :  { %v1576_v48 = vpop.permute.xlu0 %1575 }
 0xa61   :  { %v1585_v49 = vsel %vm865_vm12, %v1583_v47, %v1576_v48 }
 0xa62   :  { %1840 = vmatmul.msk.f32.vlgmr.msrb.gmra.mxu3 %vm218_vm0, %v1585_v49 }
 0xa6a   :  { %v1570_v51 = vpop.permute.xlu1 %1569 }
 0xa6b   :  { %v1584_v53 = vsel %vm862_vm11, %v1582_v52, %v1570_v51  ;;  %v1716_v51 = vld [vmem:[%s2786_s18 + $0x8] sm:$0xff]  ;;  %v1715_v52 = vld [vmem:[%s2786_s18] sm:$0xff] }
 0xa6c   :  { %1748 = vmatpush.msra.mxu2 %v1716_v51 }
 0xa6e   :  { %1749 = vmatpush.msra.mxu2 %v1715_v52 }
 0xa72   :  { %v1578_v54 = vpop.permute.xlu0 %1577 }
 0xa73   :  { %v1586_v55 = vsel %vm865_vm12, %v1584_v53, %v1578_v54  ;;  %v1894_v53 = vld [vmem:[%s2785_s17] ss:$0 sm:$0xff]  ;;  %vm1727_vm12 = vcmask 523264   ;;  %s2255_s17 = smov [#allocation17]  }
 0xa74   :  { %1841 = vmatmul.msk.f32.gmra.mxu3 %vm218_vm0, %v1586_v55  ;;  %s1765_s18 = sshll.u32 %s2255_s17, 4  ;;  %s1766_s18 = int_to_ptr.vmem [resolvable:$true] %s1765_s18 }
 0xae5   :  { %v1618_v58 = vpop.f32.mrf.mxu3 }
 0xae6   :  { %v1619_v59 = vadd.f32 %v1893_v56, %v1618_v58 }
 0xae8   :  { %v2709_v61 = vadd.f32 %v1619_v59, %v2568_v30 }
 0xaea   :  { %v1626_v62 = vsel %vm218_vm0, %v2709_v61, 0.0 }
 0xaeb   :  { %1627 = vadd.xlane.f32.xlu1 %v1626_v62 }
 0xaf7   :  { %v1621_v63 = vpop.f32.mrf.mxu3 }
 0xaf8   :  { %v1622_v1 = vadd.f32 %v1893_v56, %v1621_v63  ;;  %v1895_v63 = vld [vmem:[%s2807_s27] ss:$0 sm:$0xff] }
 0xafa   :  { %v2714_v3 = vadd.f32 %v1622_v1, %v2573_v34 }
 0xafc   :  { %v1629_v4 = vsel %vm218_vm0, %v2714_v3, 0.0 }
 0xafd   :  { %1630 = vadd.xlane.f32.xlu2 %v1629_v4 }
 0xb5e   :  { %v1628_v5 = vpop.xlane.xlu1 %1627 }
 0xb5f   :  { %v1632_v6 = vmul.f32 %v1628_v5, %v2416_v10 }
 0xb61   :  { %v1634_v20 = vsub.f32 %v2709_v61, %v1632_v6 }
 0xb63   :  { %v1636_v30 = vmul.f32 %v1634_v20, %v1634_v20 }
 0xb65   :  { %v1638_v7 = vsel %vm218_vm0, %v1636_v30, 0.0 }
 0xb66   :  { %1639 = vadd.xlane.f32.xlu0 %v1638_v7 }
 0xb70   :  { %v1631_v8 = vpop.xlane.xlu2 %1630 }
 0xb71   :  { %v1633_v9 = vmul.f32 %v1631_v8, %v2416_v10 }
 0xb73   :  { %v1635_v11 = vsub.f32 %v2714_v3, %v1633_v9 }
 0xb75   :  { %v1637_v34 = vmul.f32 %v1635_v11, %v1635_v11 }
 0xb77   :  { %v1641_v57 = vsel %vm218_vm0, %v1637_v34, 0.0 }
 0xb78   :  { %1642 = vadd.xlane.f32.xlu2 %v1641_v57 }
 0xbd9   :  { %v1640_v40 = vpop.xlane.xlu0 %1639 }
 0xbda   :  { %v1644_v15 = vmul.f32 %v1640_v40, %v2416_v10 }
 0xbdc   :  { %v1646_v16 = vadd.f32 1e-06, %v1644_v15 }
 0xbde   :  { %1970 = vrsqrt.f32 %v1646_v16  ;;  %vm1654_vm7 = vweird.f32 %v1646_v16 }
 0xbe4   :  { %v1971_v17 = vpop.eup %1970 }
 0xbe5   :  { %v1649_v18 = vmul.f32 %v1971_v17, %v1646_v16  ;;  %vm1655_vm6 = vweird.f32 %v1971_v17 }
 0xbe6   :  { %vm1656_vm8 = vmor %vm1654_vm7, %vm1655_vm6 }
 0xbe7   :  { %v1650_v19 = vmul.f32 %v1971_v17, %v1649_v18 }
 0xbe9   :  { %v1651_v26 = vmul.f32 0.5, %v1650_v19 }
 0xbeb   :  { %v1652_v24 = vsub.f32 1.5, %v1651_v26  ;;  %v1643_v25 = vpop.xlane.xlu2 %1642 }
 0xbec   :  { %v1645_v27 = vmul.f32 %v1643_v25, %v2416_v10 }
 0xbed   :  { %v1653_v29 = vmul.f32 %v1971_v17, %v1652_v24 }
 0xbee   :  { %v1647_v33 = vadd.f32 1e-06, %v1645_v27 }
 0xbef   :  { %v1657_v37 = vsel %vm1656_vm8, %v1971_v17, %v1653_v29 }
 0xbf0   :  { %v1668_v10 = vmul.f32 %v1657_v37, %v1634_v20  ;;  %1972 = vrsqrt.f32 %v1647_v33  ;;  %vm1664_vm10 = vweird.f32 %v1647_v33 }
 0xbf2   :  { %v1671_v0 = vmul.f32 %v1670_v32, %v1668_v10 }
 0xbf4   :  { %v1674_v39 = vadd.f32 %v1673_v38, %v1671_v0 }
 0xbf6   :  { %v1973_v41 = vpop.eup %1972  ;;  %1842 = vmatmul.msk.f32.vlgmr.msra.gmra.mxu1 %vm218_vm0, %v1674_v39 }
 0xbf7   :  { %v1659_v2 = vmul.f32 %v1973_v41, %v1647_v33  ;;  %vm1665_vm9 = vweird.f32 %v1973_v41 }
 0xbf8   :  { %vm1666_vm11 = vmor %vm1664_vm10, %vm1665_vm9 }
 0xbf9   :  { %v1660_v42 = vmul.f32 %v1973_v41, %v1659_v2 }
 0xbfb   :  { %v1661_v43 = vmul.f32 0.5, %v1660_v42 }
 0xbfd   :  { %v1662_v44 = vsub.f32 1.5, %v1661_v43 }
 0xbff   :  { %v1663_v45 = vmul.f32 %v1973_v41, %v1662_v44 }
 0xc01   :  { %v1667_v46 = vsel %vm1666_vm11, %v1973_v41, %v1663_v45 }
 0xc02   :  { %v1669_v47 = vmul.f32 %v1667_v46, %v1635_v11 }
 0xc04   :  { %v1672_v48 = vmul.f32 %v1670_v32, %v1669_v47 }
 0xc06   :  { %v1675_v49 = vadd.f32 %v1673_v38, %v1672_v48 }
 0xc08   :  { %1843 = vmatmul.msk.f32.gmra.mxu1 %vm218_vm0, %v1675_v49 }
 0xc73   :  { %v1707_v54 = vpop.f32.mrf.mxu1 }
 0xc74   :  { %v1708_v55 = vadd.f32 %v1894_v53, %v1707_v54 }
 0xc76   :  { %v1713_v56 = vmax.f32 %v1708_v55, 0.0 }
 0xc78   :  { %1844 = vmatmul.msk.f32.vlgmr.msra.gmra.mxu2 %vm1727_vm12, %v1713_v56 }
 0xc85   :  { %v1710_v58 = vpop.f32.mrf.mxu1 }
 0xc86   :  { %v1711_v59 = vadd.f32 %v1894_v53, %v1710_v58 }
 0xc88   :  { %v1714_v62 = vmax.f32 %v1711_v59, 0.0 }
 0xc8a   :  { %1845 = vmatmul.msk.f32.gmra.mxu2 %vm1727_vm12, %v1714_v62 }
 0xcfb   :  { %v1751_v1 = vpop.f32.mrf.mxu2 }
 0xcfc   :  { %v1752_v4 = vadd.f32 %v1895_v63, %v1751_v1 }
 0xcfe   :  { %v1757_v5 = vadd.f32 %v1752_v4, %v2709_v61 }
 0xd00   :  { %1759 = vst.msk [vmem:[#allocation17] sm:$0xff] %vm218_vm0, %v1757_v5 }
 0xd0d   :  { %v1754_v6 = vpop.f32.mrf.mxu2 }
 0xd0e   :  { %v1755_v20 = vadd.f32 %v1895_v63, %v1754_v6 }
 0xd10   :  { %v1758_v30 = vadd.f32 %v1755_v20, %v2714_v3 }
 0xd12   :  { %1760 = vst.msk [vmem:[#allocation17 + $0x8] sm:$0xff] %vm218_vm0, %v1758_v30 }
 0xd13   :  { %1773 = dma.vmem_to_hbm [thread:$0]  %s1766_s18, 256, %s1768_s25, [#allocation4], %s2804_s5, %s2804_s5, %s2803_s0  }
 0xd14   :  { %2226 = dma.done.wait [#allocation4], 256  }
 0xd15   :  { %2227 = vsyncadd [#allocation4], 4294967040 }
 0xd16   :  { %1778 = vsyncpa [#allocation3], 1 }
 0xd17   :  { %1779 = vsyncpa [#allocation6], 1 }
 0xd18   :  { %1780 = vsyncpa [#allocation9], 1 }
 0xd19   :  { %1781 = vsyncpa [#allocation12], 1 }
 0xd1a   :  { %1782 = vsyncpa [#allocation15], 1 }
 0xd1b   :  { %1783 = vsyncpa [#allocation4], 1 }

</bundles_post_ra>
